<compile_context>
chip_gen: v6e
topology: v6e:2x2x1
jax: 0.10.0
libtpu: 0.0.40
codegen_flags: <defaults>
</compile_context>

<pallas_src>
import functools

import jax
import jax.numpy as jnp
from jax.experimental import pallas as pl
from jax.experimental.pallas import tpu as pltpu


# ----------------------------------------------------------------------------
# Fused kernel: all GRU layers + head in one grid-less pallas_call.
# refs = [x2d, (4 refs per layer)..., fc1_wT, fc1_b, fc_wT, fc_b, out, seq_scratch]
# ----------------------------------------------------------------------------
def _fused_gru_kernel(*refs, num_layers, seq_len, batch, hidden):
    T, B, H = seq_len, batch, hidden
    n_in = 1 + 4 * num_layers + 4

    x_ref = refs[0]
    layer_refs = refs[1:1 + 4 * num_layers]
    w1_ref, b1_ref, w2_ref, b2_ref = refs[1 + 4 * num_layers:n_in]
    out_ref = refs[n_in]
    seq_ref = refs[n_in + 1]          # VMEM scratch: (T*B, H) hidden-state sequence

    # x arrives batch-major (B*T, I) (free contiguous reshape in the wrapper; no
    # separate XLA transpose op). Interleave to time-major (T*B, I) once, outside
    # the serial recurrence, using only static row slices + a single concat.
    x2d = x_ref[...]
    x = jnp.concatenate(
        [x2d[b * T + t: b * T + t + 1, :] for t in range(T) for b in range(B)],
        axis=0)                                            # (T*B, I), row t*B + b

    h = jnp.zeros((B, H), jnp.float32)
    for layer in range(num_layers):
        wih, whh, bx, bhn = layer_refs[4 * layer:4 * (layer + 1)]
        last = layer == num_layers - 1

        # Hoisted input projection: ONE tall fused matmul per layer -> (T*B, 3H).
        # bx already contains b_ih_r+b_hh_r | b_ih_z+b_hh_z | b_ih_n.
        gx = jnp.dot(x, wih[...], preferred_element_type=jnp.float32) + bx[...]
        gx_r = gx[:, :H]
        gx_z = gx[:, H:2 * H]
        gx_n = gx[:, 2 * H:]

        whh_v = whh[...]                                   # fused (H, 3H) recurrent RHS
        bhn_b = jnp.broadcast_to(bhn[...], (B, H))         # broadcast hoisted out of loop

        h = jnp.zeros((B, H), jnp.float32)
        # T is small and static -> fully unrolled recurrence with static slices.
        for t in range(T):
            sl = slice(t * B, (t + 1) * B)
            # Single fused matmul on the serial critical path (was 3 per step).
            gh = jnp.dot(h, whh_v, preferred_element_type=jnp.float32)   # (B, 3H)
            r = jax.nn.sigmoid(gx_r[sl] + gh[:, :H])
            z = jax.nn.sigmoid(gx_z[sl] + gh[:, H:2 * H])
            n = jnp.tanh(gx_n[sl] + r * (gh[:, 2 * H:] + bhn_b))
            h = (1.0 - z) * n + z * h
            if not last:
                # Intermediate layers: stream h_t into VMEM scratch (time-major).
                seq_ref[pl.ds(t * B, B), :] = h

        if not last:
            x = seq_ref[...]                               # next layer input (T*B, H)

    # Head on the final hidden state only: relu -> fc_1 -> relu -> fc.
    y = jnp.maximum(h, 0.0)
    y = jnp.maximum(
        jnp.dot(y, w1_ref[...], preferred_element_type=jnp.float32) + b1_ref[...], 0.0)
    out_ref[...] = (
        jnp.dot(y, w2_ref[...], preferred_element_type=jnp.float32) + b2_ref[...])


# ----------------------------------------------------------------------------
# One-time parameter packing: transpose, fuse gates along columns, fold biases.
# Per layer: wih_fused (I, 3H), whh_fused (H, 3H), bx (1, 3H), bhn (1, H).
# ----------------------------------------------------------------------------
def pack_params(params):
    flat = []
    for (w_ih, w_hh, b_ih, b_hh) in params["gru_layers"]:
        H = w_hh.shape[1]
        wih_fused = w_ih.T.astype(jnp.float32)   # (I, 3H), columns ordered r | z | n
        whh_fused = w_hh.T.astype(jnp.float32)   # (H, 3H)
        bx = jnp.concatenate(
            [b_ih[:2 * H] + b_hh[:2 * H], b_ih[2 * H:]]
        ).reshape(1, 3 * H).astype(jnp.float32)
        bhn = b_hh[2 * H:].reshape(1, H).astype(jnp.float32)
        flat += [wih_fused, whh_fused, bx, bhn]

    F1 = params["fc1_w"].shape[0]
    C = params["fc_w"].shape[0]
    flat += [
        params["fc1_w"].T.astype(jnp.float32),
        params["fc1_b"].reshape(1, F1).astype(jnp.float32),
        params["fc_w"].T.astype(jnp.float32),
        params["fc_b"].reshape(1, C).astype(jnp.float32),
    ]
    return flat


# ----------------------------------------------------------------------------
# Model forward: one pallas_call for the entire module.
# ----------------------------------------------------------------------------
@jax.jit
def gru_model_forward(x_bti, packed_flat):
    B, T, I = x_bti.shape
    num_layers = (len(packed_flat) - 4) // 4
    H = packed_flat[1].shape[0]            # whh_fused of layer 0: (H, 3H)
    C = packed_flat[-1].shape[1]           # fc_b: (1, C)

    # Contiguous (B,T,I)->(B*T,I) reshape is a layout-preserving bitcast (no copy,
    # no transpose op); the time-major interleave happens inside the kernel.
    x2d = x_bti.reshape(B * T, I).astype(jnp.float32)

    kernel = functools.partial(
        _fused_gru_kernel, num_layers=num_layers, seq_len=T, batch=B, hidden=H)

    vmem = pl.BlockSpec(memory_space=pltpu.MemorySpace.VMEM)
    n_in = 1 + len(packed_flat)

    # TODO(synk): for larger H/T/B, tile the time dimension / stream per-layer
    # weights (v7x: 64 MiB physical, 32 MiB scoped VMEM default) and add a batch
    # grid axis with dimension_semantics=("parallel",) to use the 2nd TensorCore.
    return pl.pallas_call(
        kernel,
        out_shape=jax.ShapeDtypeStruct((B, C), jnp.float32),
        in_specs=[vmem] * n_in,
        out_specs=vmem,
        scratch_shapes=[pltpu.VMEM((T * B, H), jnp.float32)],
    )(x2d, *packed_flat)


# ----------------------------------------------------------------------------
# Pure-JAX reference (correctness check against the PyTorch semantics).
# ----------------------------------------------------------------------------
def gru_model_reference(x_bti, params):
    x = jnp.transpose(x_bti, (1, 0, 2)).astype(jnp.float32)
    T, B, _ = x.shape
    for (w_ih, w_hh, b_ih, b_hh) in params["gru_layers"]:
        H = w_hh.shape[1]
        h = jnp.zeros((B, H), jnp.float32)
        outs = []
        for t in range(T):
            gx = x[t] @ w_ih.T + b_ih
            gh = h @ w_hh.T + b_hh
            r = jax.nn.sigmoid(gx[:, :H] + gh[:, :H])
            z = jax.nn.sigmoid(gx[:, H:2 * H] + gh[:, H:2 * H])
            n = jnp.tanh(gx[:, 2 * H:] + r * gh[:, 2 * H:])
            h = (1.0 - z) * n + z * h
            outs.append(h)
        x = jnp.stack(outs, axis=0)
    h_last = jnp.maximum(x[-1], 0.0)
    y = jnp.maximum(h_last @ params["fc1_w"].T + params["fc1_b"], 0.0)
    return y @ params["fc_w"].T + params["fc_b"]


def init_params(key, num_classes, input_size, hidden_size, num_layers):
    ks = jax.random.split(key, 4 * num_layers + 4)
    k = 1.0 / jnp.sqrt(hidden_size)
    layers = []
    idx = 0
    for layer in range(num_layers):
        in_sz = input_size if layer == 0 else hidden_size
        w_ih = jax.random.uniform(ks[idx + 0], (3 * hidden_size, in_sz), jnp.float32, -k, k)
        w_hh = jax.random.uniform(ks[idx + 1], (3 * hidden_size, hidden_size), jnp.float32, -k, k)
        b_ih = jax.random.uniform(ks[idx + 2], (3 * hidden_size,), jnp.float32, -k, k)
        b_hh = jax.random.uniform(ks[idx + 3], (3 * hidden_size,), jnp.float32, -k, k)
        layers.append((w_ih, w_hh, b_ih, b_hh))
        idx += 4
    k1 = 1.0 / jnp.sqrt(hidden_size)
    fc1_w = jax.random.uniform(ks[idx + 0], (128, hidden_size), jnp.float32, -k1, k1)
    fc1_b = jax.random.uniform(ks[idx + 1], (128,), jnp.float32, -k1, k1)
    k2 = 1.0 / jnp.sqrt(128.0)
    fc_w = jax.random.uniform(ks[idx + 2], (num_classes, 128), jnp.float32, -k2, k2)
    fc_b = jax.random.uniform(ks[idx + 3], (num_classes,), jnp.float32, -k2, k2)
    return {"gru_layers": layers, "fc1_w": fc1_w, "fc1_b": fc1_b,
            "fc_w": fc_w, "fc_b": fc_b}


if __name__ == "__main__":
    # Small, module-consistent shapes.
    batch = 2
    seq_length = 8
    input_size = 16
    hidden_size = 32
    num_layers = 2
    num_classes = 5

    key = jax.random.PRNGKey(0)
    kx, kp = jax.random.split(key)
    x = jax.random.normal(kx, (batch, seq_length, input_size), jnp.float32)
    params = init_params(kp, num_classes, input_size, hidden_size, num_layers)

    packed = pack_params(params)            # one-time weight packing
    out = gru_model_forward(x, packed)
    out = jax.block_until_ready(out)

    ref = gru_model_reference(x, params)
    assert out.shape == (batch, num_classes)
    assert jnp.allclose(out, ref, atol=1e-4, rtol=1e-3), "Pallas output mismatch vs reference"

    print("KERNEL_OK")
</pallas_src>

<mosaic_0001>
module attributes {stable_mosaic.version = 11 : i64} {
  func.func @_fused_gru_kernel(%arg0: memref<16x16xf32, #tpu.memory_space<vmem>>, %arg1: memref<16x96xf32, #tpu.memory_space<vmem>>, %arg2: memref<32x96xf32, #tpu.memory_space<vmem>>, %arg3: memref<1x96xf32, #tpu.memory_space<vmem>>, %arg4: memref<1x32xf32, #tpu.memory_space<vmem>>, %arg5: memref<32x96xf32, #tpu.memory_space<vmem>>, %arg6: memref<32x96xf32, #tpu.memory_space<vmem>>, %arg7: memref<1x96xf32, #tpu.memory_space<vmem>>, %arg8: memref<1x32xf32, #tpu.memory_space<vmem>>, %arg9: memref<32x128xf32, #tpu.memory_space<vmem>>, %arg10: memref<1x128xf32, #tpu.memory_space<vmem>>, %arg11: memref<128x5xf32, #tpu.memory_space<vmem>>, %arg12: memref<1x5xf32, #tpu.memory_space<vmem>>, %arg13: memref<2x5xf32, #tpu.memory_space<vmem>>, %arg14: memref<16x32xf32, #tpu.memory_space<vmem>>) attributes {dimension_semantics = [], scalar_prefetch = 0 : i64, scratch_operands = 1 : i64, tpu.core_type = #tpu.core_type<tc>} {
    %c0 = arith.constant 0 : index
    %c0_0 = arith.constant 0 : index
    %0 = vector.load %arg0[%c0, %c0_0] : memref<16x16xf32, #tpu.memory_space<vmem>>, vector<16x16xf32>
    %1 = vector.extract_strided_slice %0 {offsets = [0, 0], sizes = [1, 16], strides = [1, 1]} : vector<16x16xf32> to vector<1x16xf32>
    %2 = vector.extract_strided_slice %0 {offsets = [8, 0], sizes = [1, 16], strides = [1, 1]} : vector<16x16xf32> to vector<1x16xf32>
    %3 = vector.extract_strided_slice %0 {offsets = [1, 0], sizes = [1, 16], strides = [1, 1]} : vector<16x16xf32> to vector<1x16xf32>
    %4 = vector.extract_strided_slice %0 {offsets = [9, 0], sizes = [1, 16], strides = [1, 1]} : vector<16x16xf32> to vector<1x16xf32>
    %5 = vector.extract_strided_slice %0 {offsets = [2, 0], sizes = [1, 16], strides = [1, 1]} : vector<16x16xf32> to vector<1x16xf32>
    %6 = vector.extract_strided_slice %0 {offsets = [10, 0], sizes = [1, 16], strides = [1, 1]} : vector<16x16xf32> to vector<1x16xf32>
    %7 = vector.extract_strided_slice %0 {offsets = [3, 0], sizes = [1, 16], strides = [1, 1]} : vector<16x16xf32> to vector<1x16xf32>
    %8 = vector.extract_strided_slice %0 {offsets = [11, 0], sizes = [1, 16], strides = [1, 1]} : vector<16x16xf32> to vector<1x16xf32>
    %9 = vector.extract_strided_slice %0 {offsets = [4, 0], sizes = [1, 16], strides = [1, 1]} : vector<16x16xf32> to vector<1x16xf32>
    %10 = vector.extract_strided_slice %0 {offsets = [12, 0], sizes = [1, 16], strides = [1, 1]} : vector<16x16xf32> to vector<1x16xf32>
    %11 = vector.extract_strided_slice %0 {offsets = [5, 0], sizes = [1, 16], strides = [1, 1]} : vector<16x16xf32> to vector<1x16xf32>
    %12 = vector.extract_strided_slice %0 {offsets = [13, 0], sizes = [1, 16], strides = [1, 1]} : vector<16x16xf32> to vector<1x16xf32>
    %13 = vector.extract_strided_slice %0 {offsets = [6, 0], sizes = [1, 16], strides = [1, 1]} : vector<16x16xf32> to vector<1x16xf32>
    %14 = vector.extract_strided_slice %0 {offsets = [14, 0], sizes = [1, 16], strides = [1, 1]} : vector<16x16xf32> to vector<1x16xf32>
    %15 = vector.extract_strided_slice %0 {offsets = [7, 0], sizes = [1, 16], strides = [1, 1]} : vector<16x16xf32> to vector<1x16xf32>
    %16 = vector.extract_strided_slice %0 {offsets = [15, 0], sizes = [1, 16], strides = [1, 1]} : vector<16x16xf32> to vector<1x16xf32>
    %17 = tpu.concatenate %1, %2, %3, %4, %5, %6, %7, %8, %9, %10, %11, %12, %13, %14, %15, %16 in 0 : vector<1x16xf32>, vector<1x16xf32>, vector<1x16xf32>, vector<1x16xf32>, vector<1x16xf32>, vector<1x16xf32>, vector<1x16xf32>, vector<1x16xf32>, vector<1x16xf32>, vector<1x16xf32>, vector<1x16xf32>, vector<1x16xf32>, vector<1x16xf32>, vector<1x16xf32>, vector<1x16xf32>, vector<1x16xf32> -> vector<16x16xf32>
    %c0_1 = arith.constant 0 : index
    %c0_2 = arith.constant 0 : index
    %18 = vector.load %arg1[%c0_1, %c0_2] : memref<16x96xf32, #tpu.memory_space<vmem>>, vector<16x96xf32>
    %cst = arith.constant dense<0.000000e+00> : vector<16x96xf32>
    %19 = tpu.matmul %17, %18, %cst {dimension_numbers = #tpu.dot_dimension_numbers<[1], [0], [0], [1], [0, 0, 1, 1], [], []>} : vector<16x16xf32>, vector<16x96xf32>, vector<16x96xf32> -> vector<16x96xf32>
    %c0_3 = arith.constant 0 : index
    %c0_4 = arith.constant 0 : index
    %20 = vector.load %arg3[%c0_3, %c0_4] : memref<1x96xf32, #tpu.memory_space<vmem>>, vector<1x96xf32>
    %21 = vector.broadcast %20 : vector<1x96xf32> to vector<16x96xf32>
    %22 = arith.addf %19, %21 : vector<16x96xf32>
    %23 = vector.extract_strided_slice %22 {offsets = [0, 0], sizes = [16, 32], strides = [1, 1]} : vector<16x96xf32> to vector<16x32xf32>
    %24 = vector.extract_strided_slice %22 {offsets = [0, 32], sizes = [16, 32], strides = [1, 1]} : vector<16x96xf32> to vector<16x32xf32>
    %25 = vector.extract_strided_slice %22 {offsets = [0, 64], sizes = [16, 32], strides = [1, 1]} : vector<16x96xf32> to vector<16x32xf32>
    %c0_5 = arith.constant 0 : index
    %c0_6 = arith.constant 0 : index
    %26 = vector.load %arg2[%c0_5, %c0_6] : memref<32x96xf32, #tpu.memory_space<vmem>>, vector<32x96xf32>
    %c0_7 = arith.constant 0 : index
    %c0_8 = arith.constant 0 : index
    %27 = vector.load %arg4[%c0_7, %c0_8] : memref<1x32xf32, #tpu.memory_space<vmem>>, vector<1x32xf32>
    %28 = vector.shape_cast %27 : vector<1x32xf32> to vector<1x32xf32>
    %29 = vector.broadcast %28 : vector<1x32xf32> to vector<2x32xf32>
    %cst_9 = arith.constant 0.000000e+00 : f32
    %30 = vector.broadcast %cst_9 : f32 to vector<2x32xf32>
    %cst_10 = arith.constant dense<0.000000e+00> : vector<2x96xf32>
    %31 = tpu.matmul %30, %26, %cst_10 {dimension_numbers = #tpu.dot_dimension_numbers<[1], [0], [0], [1], [0, 0, 1, 1], [], []>} : vector<2x32xf32>, vector<32x96xf32>, vector<2x96xf32> -> vector<2x96xf32>
    %32 = vector.extract_strided_slice %23 {offsets = [0, 0], sizes = [2, 32], strides = [1, 1]} : vector<16x32xf32> to vector<2x32xf32>
    %33 = vector.extract_strided_slice %31 {offsets = [0, 0], sizes = [2, 32], strides = [1, 1]} : vector<2x96xf32> to vector<2x32xf32>
    %34 = arith.addf %32, %33 : vector<2x32xf32>
    %35 = arith.negf %34 : vector<2x32xf32>
    %36 = math.exp %35 : vector<2x32xf32>
    %cst_11 = arith.constant 1.000000e+00 : f32
    %37 = vector.broadcast %cst_11 : f32 to vector<2x32xf32>
    %38 = arith.addf %37, %36 : vector<2x32xf32>
    %39 = arith.divf %37, %38 : vector<2x32xf32>
    %40 = vector.extract_strided_slice %24 {offsets = [0, 0], sizes = [2, 32], strides = [1, 1]} : vector<16x32xf32> to vector<2x32xf32>
    %41 = vector.extract_strided_slice %31 {offsets = [0, 32], sizes = [2, 32], strides = [1, 1]} : vector<2x96xf32> to vector<2x32xf32>
    %42 = arith.addf %40, %41 : vector<2x32xf32>
    %43 = arith.negf %42 : vector<2x32xf32>
    %44 = math.exp %43 : vector<2x32xf32>
    %cst_12 = arith.constant 1.000000e+00 : f32
    %45 = vector.broadcast %cst_12 : f32 to vector<2x32xf32>
    %46 = arith.addf %45, %44 : vector<2x32xf32>
    %47 = arith.divf %45, %46 : vector<2x32xf32>
    %48 = vector.extract_strided_slice %25 {offsets = [0, 0], sizes = [2, 32], strides = [1, 1]} : vector<16x32xf32> to vector<2x32xf32>
    %49 = vector.extract_strided_slice %31 {offsets = [0, 64], sizes = [2, 32], strides = [1, 1]} : vector<2x96xf32> to vector<2x32xf32>
    %50 = arith.addf %49, %29 : vector<2x32xf32>
    %51 = arith.mulf %39, %50 : vector<2x32xf32>
    %52 = arith.addf %48, %51 : vector<2x32xf32>
    %53 = math.tanh %52 : vector<2x32xf32>
    %cst_13 = arith.constant 1.000000e+00 : f32
    %54 = vector.broadcast %cst_13 : f32 to vector<2x32xf32>
    %55 = arith.subf %54, %47 : vector<2x32xf32>
    %56 = arith.mulf %55, %53 : vector<2x32xf32>
    %57 = arith.mulf %47, %30 : vector<2x32xf32>
    %58 = arith.addf %56, %57 : vector<2x32xf32>
    %c0_14 = arith.constant 0 : index
    %c0_15 = arith.constant 0 : index
    %59 = vector.load %arg14[%c0_14, %c0_15] : memref<16x32xf32, #tpu.memory_space<vmem>>, vector<2x32xf32>
    tpu.vector_store %arg14[%c0_14, %c0_15], %58 {strides = array<i32>} : memref<16x32xf32, #tpu.memory_space<vmem>>, vector<2x32xf32>,
    %cst_16 = arith.constant dense<0.000000e+00> : vector<2x96xf32>
    %60 = tpu.matmul %58, %26, %cst_16 {dimension_numbers = #tpu.dot_dimension_numbers<[1], [0], [0], [1], [0, 0, 1, 1], [], []>} : vector<2x32xf32>, vector<32x96xf32>, vector<2x96xf32> -> vector<2x96xf32>
    %61 = vector.extract_strided_slice %23 {offsets = [2, 0], sizes = [2, 32], strides = [1, 1]} : vector<16x32xf32> to vector<2x32xf32>
    %62 = vector.extract_strided_slice %60 {offsets = [0, 0], sizes = [2, 32], strides = [1, 1]} : vector<2x96xf32> to vector<2x32xf32>
    %63 = arith.addf %61, %62 : vector<2x32xf32>
    %64 = arith.negf %63 : vector<2x32xf32>
    %65 = math.exp %64 : vector<2x32xf32>
    %cst_17 = arith.constant 1.000000e+00 : f32
    %66 = vector.broadcast %cst_17 : f32 to vector<2x32xf32>
    %67 = arith.addf %66, %65 : vector<2x32xf32>
    %68 = arith.divf %66, %67 : vector<2x32xf32>
    %69 = vector.extract_strided_slice %24 {offsets = [2, 0], sizes = [2, 32], strides = [1, 1]} : vector<16x32xf32> to vector<2x32xf32>
    %70 = vector.extract_strided_slice %60 {offsets = [0, 32], sizes = [2, 32], strides = [1, 1]} : vector<2x96xf32> to vector<2x32xf32>
    %71 = arith.addf %69, %70 : vector<2x32xf32>
    %72 = arith.negf %71 : vector<2x32xf32>
    %73 = math.exp %72 : vector<2x32xf32>
    %cst_18 = arith.constant 1.000000e+00 : f32
    %74 = vector.broadcast %cst_18 : f32 to vector<2x32xf32>
    %75 = arith.addf %74, %73 : vector<2x32xf32>
    %76 = arith.divf %74, %75 : vector<2x32xf32>
    %77 = vector.extract_strided_slice %25 {offsets = [2, 0], sizes = [2, 32], strides = [1, 1]} : vector<16x32xf32> to vector<2x32xf32>
    %78 = vector.extract_strided_slice %60 {offsets = [0, 64], sizes = [2, 32], strides = [1, 1]} : vector<2x96xf32> to vector<2x32xf32>
    %79 = arith.addf %78, %29 : vector<2x32xf32>
    %80 = arith.mulf %68, %79 : vector<2x32xf32>
    %81 = arith.addf %77, %80 : vector<2x32xf32>
    %82 = math.tanh %81 : vector<2x32xf32>
    %cst_19 = arith.constant 1.000000e+00 : f32
    %83 = vector.broadcast %cst_19 : f32 to vector<2x32xf32>
    %84 = arith.subf %83, %76 : vector<2x32xf32>
    %85 = arith.mulf %84, %82 : vector<2x32xf32>
    %86 = arith.mulf %76, %58 : vector<2x32xf32>
    %87 = arith.addf %85, %86 : vector<2x32xf32>
    %c2 = arith.constant 2 : index
    %c0_20 = arith.constant 0 : index
    %88 = vector.load %arg14[%c2, %c0_20] : memref<16x32xf32, #tpu.memory_space<vmem>>, vector<2x32xf32>
    tpu.vector_store %arg14[%c2, %c0_20], %87 {strides = array<i32>} : memref<16x32xf32, #tpu.memory_space<vmem>>, vector<2x32xf32>,
    %cst_21 = arith.constant dense<0.000000e+00> : vector<2x96xf32>
    %89 = tpu.matmul %87, %26, %cst_21 {dimension_numbers = #tpu.dot_dimension_numbers<[1], [0], [0], [1], [0, 0, 1, 1], [], []>} : vector<2x32xf32>, vector<32x96xf32>, vector<2x96xf32> -> vector<2x96xf32>
    %90 = vector.extract_strided_slice %23 {offsets = [4, 0], sizes = [2, 32], strides = [1, 1]} : vector<16x32xf32> to vector<2x32xf32>
    %91 = vector.extract_strided_slice %89 {offsets = [0, 0], sizes = [2, 32], strides = [1, 1]} : vector<2x96xf32> to vector<2x32xf32>
    %92 = arith.addf %90, %91 : vector<2x32xf32>
    %93 = arith.negf %92 : vector<2x32xf32>
    %94 = math.exp %93 : vector<2x32xf32>
    %cst_22 = arith.constant 1.000000e+00 : f32
    %95 = vector.broadcast %cst_22 : f32 to vector<2x32xf32>
    %96 = arith.addf %95, %94 : vector<2x32xf32>
    %97 = arith.divf %95, %96 : vector<2x32xf32>
    %98 = vector.extract_strided_slice %24 {offsets = [4, 0], sizes = [2, 32], strides = [1, 1]} : vector<16x32xf32> to vector<2x32xf32>
    %99 = vector.extract_strided_slice %89 {offsets = [0, 32], sizes = [2, 32], strides = [1, 1]} : vector<2x96xf32> to vector<2x32xf32>
    %100 = arith.addf %98, %99 : vector<2x32xf32>
    %101 = arith.negf %100 : vector<2x32xf32>
    %102 = math.exp %101 : vector<2x32xf32>
    %cst_23 = arith.constant 1.000000e+00 : f32
    %103 = vector.broadcast %cst_23 : f32 to vector<2x32xf32>
    %104 = arith.addf %103, %102 : vector<2x32xf32>
    %105 = arith.divf %103, %104 : vector<2x32xf32>
    %106 = vector.extract_strided_slice %25 {offsets = [4, 0], sizes = [2, 32], strides = [1, 1]} : vector<16x32xf32> to vector<2x32xf32>
    %107 = vector.extract_strided_slice %89 {offsets = [0, 64], sizes = [2, 32], strides = [1, 1]} : vector<2x96xf32> to vector<2x32xf32>
    %108 = arith.addf %107, %29 : vector<2x32xf32>
    %109 = arith.mulf %97, %108 : vector<2x32xf32>
    %110 = arith.addf %106, %109 : vector<2x32xf32>
    %111 = math.tanh %110 : vector<2x32xf32>
    %cst_24 = arith.constant 1.000000e+00 : f32
    %112 = vector.broadcast %cst_24 : f32 to vector<2x32xf32>
    %113 = arith.subf %112, %105 : vector<2x32xf32>
    %114 = arith.mulf %113, %111 : vector<2x32xf32>
    %115 = arith.mulf %105, %87 : vector<2x32xf32>
    %116 = arith.addf %114, %115 : vector<2x32xf32>
    %c4 = arith.constant 4 : index
    %c0_25 = arith.constant 0 : index
    %117 = vector.load %arg14[%c4, %c0_25] : memref<16x32xf32, #tpu.memory_space<vmem>>, vector<2x32xf32>
    tpu.vector_store %arg14[%c4, %c0_25], %116 {strides = array<i32>} : memref<16x32xf32, #tpu.memory_space<vmem>>, vector<2x32xf32>,
    %cst_26 = arith.constant dense<0.000000e+00> : vector<2x96xf32>
    %118 = tpu.matmul %116, %26, %cst_26 {dimension_numbers = #tpu.dot_dimension_numbers<[1], [0], [0], [1], [0, 0, 1, 1], [], []>} : vector<2x32xf32>, vector<32x96xf32>, vector<2x96xf32> -> vector<2x96xf32>
    %119 = vector.extract_strided_slice %23 {offsets = [6, 0], sizes = [2, 32], strides = [1, 1]} : vector<16x32xf32> to vector<2x32xf32>
    %120 = vector.extract_strided_slice %118 {offsets = [0, 0], sizes = [2, 32], strides = [1, 1]} : vector<2x96xf32> to vector<2x32xf32>
    %121 = arith.addf %119, %120 : vector<2x32xf32>
    %122 = arith.negf %121 : vector<2x32xf32>
    %123 = math.exp %122 : vector<2x32xf32>
    %cst_27 = arith.constant 1.000000e+00 : f32
    %124 = vector.broadcast %cst_27 : f32 to vector<2x32xf32>
    %125 = arith.addf %124, %123 : vector<2x32xf32>
    %126 = arith.divf %124, %125 : vector<2x32xf32>
    %127 = vector.extract_strided_slice %24 {offsets = [6, 0], sizes = [2, 32], strides = [1, 1]} : vector<16x32xf32> to vector<2x32xf32>
    %128 = vector.extract_strided_slice %118 {offsets = [0, 32], sizes = [2, 32], strides = [1, 1]} : vector<2x96xf32> to vector<2x32xf32>
    %129 = arith.addf %127, %128 : vector<2x32xf32>
    %130 = arith.negf %129 : vector<2x32xf32>
    %131 = math.exp %130 : vector<2x32xf32>
    %cst_28 = arith.constant 1.000000e+00 : f32
    %132 = vector.broadcast %cst_28 : f32 to vector<2x32xf32>
    %133 = arith.addf %132, %131 : vector<2x32xf32>
    %134 = arith.divf %132, %133 : vector<2x32xf32>
    %135 = vector.extract_strided_slice %25 {offsets = [6, 0], sizes = [2, 32], strides = [1, 1]} : vector<16x32xf32> to vector<2x32xf32>
    %136 = vector.extract_strided_slice %118 {offsets = [0, 64], sizes = [2, 32], strides = [1, 1]} : vector<2x96xf32> to vector<2x32xf32>
    %137 = arith.addf %136, %29 : vector<2x32xf32>
    %138 = arith.mulf %126, %137 : vector<2x32xf32>
    %139 = arith.addf %135, %138 : vector<2x32xf32>
    %140 = math.tanh %139 : vector<2x32xf32>
    %cst_29 = arith.constant 1.000000e+00 : f32
    %141 = vector.broadcast %cst_29 : f32 to vector<2x32xf32>
    %142 = arith.subf %141, %134 : vector<2x32xf32>
    %143 = arith.mulf %142, %140 : vector<2x32xf32>
    %144 = arith.mulf %134, %116 : vector<2x32xf32>
    %145 = arith.addf %143, %144 : vector<2x32xf32>
    %c6 = arith.constant 6 : index
    %c0_30 = arith.constant 0 : index
    %146 = vector.load %arg14[%c6, %c0_30] : memref<16x32xf32, #tpu.memory_space<vmem>>, vector<2x32xf32>
    tpu.vector_store %arg14[%c6, %c0_30], %145 {strides = array<i32>} : memref<16x32xf32, #tpu.memory_space<vmem>>, vector<2x32xf32>,
    %cst_31 = arith.constant dense<0.000000e+00> : vector<2x96xf32>
    %147 = tpu.matmul %145, %26, %cst_31 {dimension_numbers = #tpu.dot_dimension_numbers<[1], [0], [0], [1], [0, 0, 1, 1], [], []>} : vector<2x32xf32>, vector<32x96xf32>, vector<2x96xf32> -> vector<2x96xf32>
    %148 = vector.extract_strided_slice %23 {offsets = [8, 0], sizes = [2, 32], strides = [1, 1]} : vector<16x32xf32> to vector<2x32xf32>
    %149 = vector.extract_strided_slice %147 {offsets = [0, 0], sizes = [2, 32], strides = [1, 1]} : vector<2x96xf32> to vector<2x32xf32>
    %150 = arith.addf %148, %149 : vector<2x32xf32>
    %151 = arith.negf %150 : vector<2x32xf32>
    %152 = math.exp %151 : vector<2x32xf32>
    %cst_32 = arith.constant 1.000000e+00 : f32
    %153 = vector.broadcast %cst_32 : f32 to vector<2x32xf32>
    %154 = arith.addf %153, %152 : vector<2x32xf32>
    %155 = arith.divf %153, %154 : vector<2x32xf32>
    %156 = vector.extract_strided_slice %24 {offsets = [8, 0], sizes = [2, 32], strides = [1, 1]} : vector<16x32xf32> to vector<2x32xf32>
    %157 = vector.extract_strided_slice %147 {offsets = [0, 32], sizes = [2, 32], strides = [1, 1]} : vector<2x96xf32> to vector<2x32xf32>
    %158 = arith.addf %156, %157 : vector<2x32xf32>
    %159 = arith.negf %158 : vector<2x32xf32>
    %160 = math.exp %159 : vector<2x32xf32>
    %cst_33 = arith.constant 1.000000e+00 : f32
    %161 = vector.broadcast %cst_33 : f32 to vector<2x32xf32>
    %162 = arith.addf %161, %160 : vector<2x32xf32>
    %163 = arith.divf %161, %162 : vector<2x32xf32>
    %164 = vector.extract_strided_slice %25 {offsets = [8, 0], sizes = [2, 32], strides = [1, 1]} : vector<16x32xf32> to vector<2x32xf32>
    %165 = vector.extract_strided_slice %147 {offsets = [0, 64], sizes = [2, 32], strides = [1, 1]} : vector<2x96xf32> to vector<2x32xf32>
    %166 = arith.addf %165, %29 : vector<2x32xf32>
    %167 = arith.mulf %155, %166 : vector<2x32xf32>
    %168 = arith.addf %164, %167 : vector<2x32xf32>
    %169 = math.tanh %168 : vector<2x32xf32>
    %cst_34 = arith.constant 1.000000e+00 : f32
    %170 = vector.broadcast %cst_34 : f32 to vector<2x32xf32>
    %171 = arith.subf %170, %163 : vector<2x32xf32>
    %172 = arith.mulf %171, %169 : vector<2x32xf32>
    %173 = arith.mulf %163, %145 : vector<2x32xf32>
    %174 = arith.addf %172, %173 : vector<2x32xf32>
    %c8 = arith.constant 8 : index
    %c0_35 = arith.constant 0 : index
    %175 = vector.load %arg14[%c8, %c0_35] : memref<16x32xf32, #tpu.memory_space<vmem>>, vector<2x32xf32>
    tpu.vector_store %arg14[%c8, %c0_35], %174 {strides = array<i32>} : memref<16x32xf32, #tpu.memory_space<vmem>>, vector<2x32xf32>,
    %cst_36 = arith.constant dense<0.000000e+00> : vector<2x96xf32>
    %176 = tpu.matmul %174, %26, %cst_36 {dimension_numbers = #tpu.dot_dimension_numbers<[1], [0], [0], [1], [0, 0, 1, 1], [], []>} : vector<2x32xf32>, vector<32x96xf32>, vector<2x96xf32> -> vector<2x96xf32>
    %177 = vector.extract_strided_slice %23 {offsets = [10, 0], sizes = [2, 32], strides = [1, 1]} : vector<16x32xf32> to vector<2x32xf32>
    %178 = vector.extract_strided_slice %176 {offsets = [0, 0], sizes = [2, 32], strides = [1, 1]} : vector<2x96xf32> to vector<2x32xf32>
    %179 = arith.addf %177, %178 : vector<2x32xf32>
    %180 = arith.negf %179 : vector<2x32xf32>
    %181 = math.exp %180 : vector<2x32xf32>
    %cst_37 = arith.constant 1.000000e+00 : f32
    %182 = vector.broadcast %cst_37 : f32 to vector<2x32xf32>
    %183 = arith.addf %182, %181 : vector<2x32xf32>
    %184 = arith.divf %182, %183 : vector<2x32xf32>
    %185 = vector.extract_strided_slice %24 {offsets = [10, 0], sizes = [2, 32], strides = [1, 1]} : vector<16x32xf32> to vector<2x32xf32>
    %186 = vector.extract_strided_slice %176 {offsets = [0, 32], sizes = [2, 32], strides = [1, 1]} : vector<2x96xf32> to vector<2x32xf32>
    %187 = arith.addf %185, %186 : vector<2x32xf32>
    %188 = arith.negf %187 : vector<2x32xf32>
    %189 = math.exp %188 : vector<2x32xf32>
    %cst_38 = arith.constant 1.000000e+00 : f32
    %190 = vector.broadcast %cst_38 : f32 to vector<2x32xf32>
    %191 = arith.addf %190, %189 : vector<2x32xf32>
    %192 = arith.divf %190, %191 : vector<2x32xf32>
    %193 = vector.extract_strided_slice %25 {offsets = [10, 0], sizes = [2, 32], strides = [1, 1]} : vector<16x32xf32> to vector<2x32xf32>
    %194 = vector.extract_strided_slice %176 {offsets = [0, 64], sizes = [2, 32], strides = [1, 1]} : vector<2x96xf32> to vector<2x32xf32>
    %195 = arith.addf %194, %29 : vector<2x32xf32>
    %196 = arith.mulf %184, %195 : vector<2x32xf32>
    %197 = arith.addf %193, %196 : vector<2x32xf32>
    %198 = math.tanh %197 : vector<2x32xf32>
    %cst_39 = arith.constant 1.000000e+00 : f32
    %199 = vector.broadcast %cst_39 : f32 to vector<2x32xf32>
    %200 = arith.subf %199, %192 : vector<2x32xf32>
    %201 = arith.mulf %200, %198 : vector<2x32xf32>
    %202 = arith.mulf %192, %174 : vector<2x32xf32>
    %203 = arith.addf %201, %202 : vector<2x32xf32>
    %c10 = arith.constant 10 : index
    %c0_40 = arith.constant 0 : index
    %204 = vector.load %arg14[%c10, %c0_40] : memref<16x32xf32, #tpu.memory_space<vmem>>, vector<2x32xf32>
    tpu.vector_store %arg14[%c10, %c0_40], %203 {strides = array<i32>} : memref<16x32xf32, #tpu.memory_space<vmem>>, vector<2x32xf32>,
    %cst_41 = arith.constant dense<0.000000e+00> : vector<2x96xf32>
    %205 = tpu.matmul %203, %26, %cst_41 {dimension_numbers = #tpu.dot_dimension_numbers<[1], [0], [0], [1], [0, 0, 1, 1], [], []>} : vector<2x32xf32>, vector<32x96xf32>, vector<2x96xf32> -> vector<2x96xf32>
    %206 = vector.extract_strided_slice %23 {offsets = [12, 0], sizes = [2, 32], strides = [1, 1]} : vector<16x32xf32> to vector<2x32xf32>
    %207 = vector.extract_strided_slice %205 {offsets = [0, 0], sizes = [2, 32], strides = [1, 1]} : vector<2x96xf32> to vector<2x32xf32>
    %208 = arith.addf %206, %207 : vector<2x32xf32>
    %209 = arith.negf %208 : vector<2x32xf32>
    %210 = math.exp %209 : vector<2x32xf32>
    %cst_42 = arith.constant 1.000000e+00 : f32
    %211 = vector.broadcast %cst_42 : f32 to vector<2x32xf32>
    %212 = arith.addf %211, %210 : vector<2x32xf32>
    %213 = arith.divf %211, %212 : vector<2x32xf32>
    %214 = vector.extract_strided_slice %24 {offsets = [12, 0], sizes = [2, 32], strides = [1, 1]} : vector<16x32xf32> to vector<2x32xf32>
    %215 = vector.extract_strided_slice %205 {offsets = [0, 32], sizes = [2, 32], strides = [1, 1]} : vector<2x96xf32> to vector<2x32xf32>
    %216 = arith.addf %214, %215 : vector<2x32xf32>
    %217 = arith.negf %216 : vector<2x32xf32>
    %218 = math.exp %217 : vector<2x32xf32>
    %cst_43 = arith.constant 1.000000e+00 : f32
    %219 = vector.broadcast %cst_43 : f32 to vector<2x32xf32>
    %220 = arith.addf %219, %218 : vector<2x32xf32>
    %221 = arith.divf %219, %220 : vector<2x32xf32>
    %222 = vector.extract_strided_slice %25 {offsets = [12, 0], sizes = [2, 32], strides = [1, 1]} : vector<16x32xf32> to vector<2x32xf32>
    %223 = vector.extract_strided_slice %205 {offsets = [0, 64], sizes = [2, 32], strides = [1, 1]} : vector<2x96xf32> to vector<2x32xf32>
    %224 = arith.addf %223, %29 : vector<2x32xf32>
    %225 = arith.mulf %213, %224 : vector<2x32xf32>
    %226 = arith.addf %222, %225 : vector<2x32xf32>
    %227 = math.tanh %226 : vector<2x32xf32>
    %cst_44 = arith.constant 1.000000e+00 : f32
    %228 = vector.broadcast %cst_44 : f32 to vector<2x32xf32>
    %229 = arith.subf %228, %221 : vector<2x32xf32>
    %230 = arith.mulf %229, %227 : vector<2x32xf32>
    %231 = arith.mulf %221, %203 : vector<2x32xf32>
    %232 = arith.addf %230, %231 : vector<2x32xf32>
    %c12 = arith.constant 12 : index
    %c0_45 = arith.constant 0 : index
    %233 = vector.load %arg14[%c12, %c0_45] : memref<16x32xf32, #tpu.memory_space<vmem>>, vector<2x32xf32>
    tpu.vector_store %arg14[%c12, %c0_45], %232 {strides = array<i32>} : memref<16x32xf32, #tpu.memory_space<vmem>>, vector<2x32xf32>,
    %cst_46 = arith.constant dense<0.000000e+00> : vector<2x96xf32>
    %234 = tpu.matmul %232, %26, %cst_46 {dimension_numbers = #tpu.dot_dimension_numbers<[1], [0], [0], [1], [0, 0, 1, 1], [], []>} : vector<2x32xf32>, vector<32x96xf32>, vector<2x96xf32> -> vector<2x96xf32>
    %235 = vector.extract_strided_slice %23 {offsets = [14, 0], sizes = [2, 32], strides = [1, 1]} : vector<16x32xf32> to vector<2x32xf32>
    %236 = vector.extract_strided_slice %234 {offsets = [0, 0], sizes = [2, 32], strides = [1, 1]} : vector<2x96xf32> to vector<2x32xf32>
    %237 = arith.addf %235, %236 : vector<2x32xf32>
    %238 = arith.negf %237 : vector<2x32xf32>
    %239 = math.exp %238 : vector<2x32xf32>
    %cst_47 = arith.constant 1.000000e+00 : f32
    %240 = vector.broadcast %cst_47 : f32 to vector<2x32xf32>
    %241 = arith.addf %240, %239 : vector<2x32xf32>
    %242 = arith.divf %240, %241 : vector<2x32xf32>
    %243 = vector.extract_strided_slice %24 {offsets = [14, 0], sizes = [2, 32], strides = [1, 1]} : vector<16x32xf32> to vector<2x32xf32>
    %244 = vector.extract_strided_slice %234 {offsets = [0, 32], sizes = [2, 32], strides = [1, 1]} : vector<2x96xf32> to vector<2x32xf32>
    %245 = arith.addf %243, %244 : vector<2x32xf32>
    %246 = arith.negf %245 : vector<2x32xf32>
    %247 = math.exp %246 : vector<2x32xf32>
    %cst_48 = arith.constant 1.000000e+00 : f32
    %248 = vector.broadcast %cst_48 : f32 to vector<2x32xf32>
    %249 = arith.addf %248, %247 : vector<2x32xf32>
    %250 = arith.divf %248, %249 : vector<2x32xf32>
    %251 = vector.extract_strided_slice %25 {offsets = [14, 0], sizes = [2, 32], strides = [1, 1]} : vector<16x32xf32> to vector<2x32xf32>
    %252 = vector.extract_strided_slice %234 {offsets = [0, 64], sizes = [2, 32], strides = [1, 1]} : vector<2x96xf32> to vector<2x32xf32>
    %253 = arith.addf %252, %29 : vector<2x32xf32>
    %254 = arith.mulf %242, %253 : vector<2x32xf32>
    %255 = arith.addf %251, %254 : vector<2x32xf32>
    %256 = math.tanh %255 : vector<2x32xf32>
    %cst_49 = arith.constant 1.000000e+00 : f32
    %257 = vector.broadcast %cst_49 : f32 to vector<2x32xf32>
    %258 = arith.subf %257, %250 : vector<2x32xf32>
    %259 = arith.mulf %258, %256 : vector<2x32xf32>
    %260 = arith.mulf %250, %232 : vector<2x32xf32>
    %261 = arith.addf %259, %260 : vector<2x32xf32>
    %c14 = arith.constant 14 : index
    %c0_50 = arith.constant 0 : index
    %262 = vector.load %arg14[%c14, %c0_50] : memref<16x32xf32, #tpu.memory_space<vmem>>, vector<2x32xf32>
    tpu.vector_store %arg14[%c14, %c0_50], %261 {strides = array<i32>} : memref<16x32xf32, #tpu.memory_space<vmem>>, vector<2x32xf32>,
    %c0_51 = arith.constant 0 : index
    %c0_52 = arith.constant 0 : index
    %263 = vector.load %arg14[%c0_51, %c0_52] : memref<16x32xf32, #tpu.memory_space<vmem>>, vector<16x32xf32>
    %c0_53 = arith.constant 0 : index
    %c0_54 = arith.constant 0 : index
    %264 = vector.load %arg5[%c0_53, %c0_54] : memref<32x96xf32, #tpu.memory_space<vmem>>, vector<32x96xf32>
    %cst_55 = arith.constant dense<0.000000e+00> : vector<16x96xf32>
    %265 = tpu.matmul %263, %264, %cst_55 {dimension_numbers = #tpu.dot_dimension_numbers<[1], [0], [0], [1], [0, 0, 1, 1], [], []>} : vector<16x32xf32>, vector<32x96xf32>, vector<16x96xf32> -> vector<16x96xf32>
    %c0_56 = arith.constant 0 : index
    %c0_57 = arith.constant 0 : index
    %266 = vector.load %arg7[%c0_56, %c0_57] : memref<1x96xf32, #tpu.memory_space<vmem>>, vector<1x96xf32>
    %267 = vector.broadcast %266 : vector<1x96xf32> to vector<16x96xf32>
    %268 = arith.addf %265, %267 : vector<16x96xf32>
    %269 = vector.extract_strided_slice %268 {offsets = [0, 0], sizes = [16, 32], strides = [1, 1]} : vector<16x96xf32> to vector<16x32xf32>
    %270 = vector.extract_strided_slice %268 {offsets = [0, 32], sizes = [16, 32], strides = [1, 1]} : vector<16x96xf32> to vector<16x32xf32>
    %271 = vector.extract_strided_slice %268 {offsets = [0, 64], sizes = [16, 32], strides = [1, 1]} : vector<16x96xf32> to vector<16x32xf32>
    %c0_58 = arith.constant 0 : index
    %c0_59 = arith.constant 0 : index
    %272 = vector.load %arg6[%c0_58, %c0_59] : memref<32x96xf32, #tpu.memory_space<vmem>>, vector<32x96xf32>
    %c0_60 = arith.constant 0 : index
    %c0_61 = arith.constant 0 : index
    %273 = vector.load %arg8[%c0_60, %c0_61] : memref<1x32xf32, #tpu.memory_space<vmem>>, vector<1x32xf32>
    %274 = vector.shape_cast %273 : vector<1x32xf32> to vector<1x32xf32>
    %275 = vector.broadcast %274 : vector<1x32xf32> to vector<2x32xf32>
    %cst_62 = arith.constant 0.000000e+00 : f32
    %276 = vector.broadcast %cst_62 : f32 to vector<2x32xf32>
    %cst_63 = arith.constant dense<0.000000e+00> : vector<2x96xf32>
    %277 = tpu.matmul %276, %272, %cst_63 {dimension_numbers = #tpu.dot_dimension_numbers<[1], [0], [0], [1], [0, 0, 1, 1], [], []>} : vector<2x32xf32>, vector<32x96xf32>, vector<2x96xf32> -> vector<2x96xf32>
    %278 = vector.extract_strided_slice %269 {offsets = [0, 0], sizes = [2, 32], strides = [1, 1]} : vector<16x32xf32> to vector<2x32xf32>
    %279 = vector.extract_strided_slice %277 {offsets = [0, 0], sizes = [2, 32], strides = [1, 1]} : vector<2x96xf32> to vector<2x32xf32>
    %280 = arith.addf %278, %279 : vector<2x32xf32>
    %281 = arith.negf %280 : vector<2x32xf32>
    %282 = math.exp %281 : vector<2x32xf32>
    %cst_64 = arith.constant 1.000000e+00 : f32
    %283 = vector.broadcast %cst_64 : f32 to vector<2x32xf32>
    %284 = arith.addf %283, %282 : vector<2x32xf32>
    %285 = arith.divf %283, %284 : vector<2x32xf32>
    %286 = vector.extract_strided_slice %270 {offsets = [0, 0], sizes = [2, 32], strides = [1, 1]} : vector<16x32xf32> to vector<2x32xf32>
    %287 = vector.extract_strided_slice %277 {offsets = [0, 32], sizes = [2, 32], strides = [1, 1]} : vector<2x96xf32> to vector<2x32xf32>
    %288 = arith.addf %286, %287 : vector<2x32xf32>
    %289 = arith.negf %288 : vector<2x32xf32>
    %290 = math.exp %289 : vector<2x32xf32>
    %cst_65 = arith.constant 1.000000e+00 : f32
    %291 = vector.broadcast %cst_65 : f32 to vector<2x32xf32>
    %292 = arith.addf %291, %290 : vector<2x32xf32>
    %293 = arith.divf %291, %292 : vector<2x32xf32>
    %294 = vector.extract_strided_slice %271 {offsets = [0, 0], sizes = [2, 32], strides = [1, 1]} : vector<16x32xf32> to vector<2x32xf32>
    %295 = vector.extract_strided_slice %277 {offsets = [0, 64], sizes = [2, 32], strides = [1, 1]} : vector<2x96xf32> to vector<2x32xf32>
    %296 = arith.addf %295, %275 : vector<2x32xf32>
    %297 = arith.mulf %285, %296 : vector<2x32xf32>
    %298 = arith.addf %294, %297 : vector<2x32xf32>
    %299 = math.tanh %298 : vector<2x32xf32>
    %cst_66 = arith.constant 1.000000e+00 : f32
    %300 = vector.broadcast %cst_66 : f32 to vector<2x32xf32>
    %301 = arith.subf %300, %293 : vector<2x32xf32>
    %302 = arith.mulf %301, %299 : vector<2x32xf32>
    %303 = arith.mulf %293, %276 : vector<2x32xf32>
    %304 = arith.addf %302, %303 : vector<2x32xf32>
    %cst_67 = arith.constant dense<0.000000e+00> : vector<2x96xf32>
    %305 = tpu.matmul %304, %272, %cst_67 {dimension_numbers = #tpu.dot_dimension_numbers<[1], [0], [0], [1], [0, 0, 1, 1], [], []>} : vector<2x32xf32>, vector<32x96xf32>, vector<2x96xf32> -> vector<2x96xf32>
    %306 = vector.extract_strided_slice %269 {offsets = [2, 0], sizes = [2, 32], strides = [1, 1]} : vector<16x32xf32> to vector<2x32xf32>
    %307 = vector.extract_strided_slice %305 {offsets = [0, 0], sizes = [2, 32], strides = [1, 1]} : vector<2x96xf32> to vector<2x32xf32>
    %308 = arith.addf %306, %307 : vector<2x32xf32>
    %309 = arith.negf %308 : vector<2x32xf32>
    %310 = math.exp %309 : vector<2x32xf32>
    %cst_68 = arith.constant 1.000000e+00 : f32
    %311 = vector.broadcast %cst_68 : f32 to vector<2x32xf32>
    %312 = arith.addf %311, %310 : vector<2x32xf32>
    %313 = arith.divf %311, %312 : vector<2x32xf32>
    %314 = vector.extract_strided_slice %270 {offsets = [2, 0], sizes = [2, 32], strides = [1, 1]} : vector<16x32xf32> to vector<2x32xf32>
    %315 = vector.extract_strided_slice %305 {offsets = [0, 32], sizes = [2, 32], strides = [1, 1]} : vector<2x96xf32> to vector<2x32xf32>
    %316 = arith.addf %314, %315 : vector<2x32xf32>
    %317 = arith.negf %316 : vector<2x32xf32>
    %318 = math.exp %317 : vector<2x32xf32>
    %cst_69 = arith.constant 1.000000e+00 : f32
    %319 = vector.broadcast %cst_69 : f32 to vector<2x32xf32>
    %320 = arith.addf %319, %318 : vector<2x32xf32>
    %321 = arith.divf %319, %320 : vector<2x32xf32>
    %322 = vector.extract_strided_slice %271 {offsets = [2, 0], sizes = [2, 32], strides = [1, 1]} : vector<16x32xf32> to vector<2x32xf32>
    %323 = vector.extract_strided_slice %305 {offsets = [0, 64], sizes = [2, 32], strides = [1, 1]} : vector<2x96xf32> to vector<2x32xf32>
    %324 = arith.addf %323, %275 : vector<2x32xf32>
    %325 = arith.mulf %313, %324 : vector<2x32xf32>
    %326 = arith.addf %322, %325 : vector<2x32xf32>
    %327 = math.tanh %326 : vector<2x32xf32>
    %cst_70 = arith.constant 1.000000e+00 : f32
    %328 = vector.broadcast %cst_70 : f32 to vector<2x32xf32>
    %329 = arith.subf %328, %321 : vector<2x32xf32>
    %330 = arith.mulf %329, %327 : vector<2x32xf32>
    %331 = arith.mulf %321, %304 : vector<2x32xf32>
    %332 = arith.addf %330, %331 : vector<2x32xf32>
    %cst_71 = arith.constant dense<0.000000e+00> : vector<2x96xf32>
    %333 = tpu.matmul %332, %272, %cst_71 {dimension_numbers = #tpu.dot_dimension_numbers<[1], [0], [0], [1], [0, 0, 1, 1], [], []>} : vector<2x32xf32>, vector<32x96xf32>, vector<2x96xf32> -> vector<2x96xf32>
    %334 = vector.extract_strided_slice %269 {offsets = [4, 0], sizes = [2, 32], strides = [1, 1]} : vector<16x32xf32> to vector<2x32xf32>
    %335 = vector.extract_strided_slice %333 {offsets = [0, 0], sizes = [2, 32], strides = [1, 1]} : vector<2x96xf32> to vector<2x32xf32>
    %336 = arith.addf %334, %335 : vector<2x32xf32>
    %337 = arith.negf %336 : vector<2x32xf32>
    %338 = math.exp %337 : vector<2x32xf32>
    %cst_72 = arith.constant 1.000000e+00 : f32
    %339 = vector.broadcast %cst_72 : f32 to vector<2x32xf32>
    %340 = arith.addf %339, %338 : vector<2x32xf32>
    %341 = arith.divf %339, %340 : vector<2x32xf32>
    %342 = vector.extract_strided_slice %270 {offsets = [4, 0], sizes = [2, 32], strides = [1, 1]} : vector<16x32xf32> to vector<2x32xf32>
    %343 = vector.extract_strided_slice %333 {offsets = [0, 32], sizes = [2, 32], strides = [1, 1]} : vector<2x96xf32> to vector<2x32xf32>
    %344 = arith.addf %342, %343 : vector<2x32xf32>
    %345 = arith.negf %344 : vector<2x32xf32>
    %346 = math.exp %345 : vector<2x32xf32>
    %cst_73 = arith.constant 1.000000e+00 : f32
    %347 = vector.broadcast %cst_73 : f32 to vector<2x32xf32>
    %348 = arith.addf %347, %346 : vector<2x32xf32>
    %349 = arith.divf %347, %348 : vector<2x32xf32>
    %350 = vector.extract_strided_slice %271 {offsets = [4, 0], sizes = [2, 32], strides = [1, 1]} : vector<16x32xf32> to vector<2x32xf32>
    %351 = vector.extract_strided_slice %333 {offsets = [0, 64], sizes = [2, 32], strides = [1, 1]} : vector<2x96xf32> to vector<2x32xf32>
    %352 = arith.addf %351, %275 : vector<2x32xf32>
    %353 = arith.mulf %341, %352 : vector<2x32xf32>
    %354 = arith.addf %350, %353 : vector<2x32xf32>
    %355 = math.tanh %354 : vector<2x32xf32>
    %cst_74 = arith.constant 1.000000e+00 : f32
    %356 = vector.broadcast %cst_74 : f32 to vector<2x32xf32>
    %357 = arith.subf %356, %349 : vector<2x32xf32>
    %358 = arith.mulf %357, %355 : vector<2x32xf32>
    %359 = arith.mulf %349, %332 : vector<2x32xf32>
    %360 = arith.addf %358, %359 : vector<2x32xf32>
    %cst_75 = arith.constant dense<0.000000e+00> : vector<2x96xf32>
    %361 = tpu.matmul %360, %272, %cst_75 {dimension_numbers = #tpu.dot_dimension_numbers<[1], [0], [0], [1], [0, 0, 1, 1], [], []>} : vector<2x32xf32>, vector<32x96xf32>, vector<2x96xf32> -> vector<2x96xf32>
    %362 = vector.extract_strided_slice %269 {offsets = [6, 0], sizes = [2, 32], strides = [1, 1]} : vector<16x32xf32> to vector<2x32xf32>
    %363 = vector.extract_strided_slice %361 {offsets = [0, 0], sizes = [2, 32], strides = [1, 1]} : vector<2x96xf32> to vector<2x32xf32>
    %364 = arith.addf %362, %363 : vector<2x32xf32>
    %365 = arith.negf %364 : vector<2x32xf32>
    %366 = math.exp %365 : vector<2x32xf32>
    %cst_76 = arith.constant 1.000000e+00 : f32
    %367 = vector.broadcast %cst_76 : f32 to vector<2x32xf32>
    %368 = arith.addf %367, %366 : vector<2x32xf32>
    %369 = arith.divf %367, %368 : vector<2x32xf32>
    %370 = vector.extract_strided_slice %270 {offsets = [6, 0], sizes = [2, 32], strides = [1, 1]} : vector<16x32xf32> to vector<2x32xf32>
    %371 = vector.extract_strided_slice %361 {offsets = [0, 32], sizes = [2, 32], strides = [1, 1]} : vector<2x96xf32> to vector<2x32xf32>
    %372 = arith.addf %370, %371 : vector<2x32xf32>
    %373 = arith.negf %372 : vector<2x32xf32>
    %374 = math.exp %373 : vector<2x32xf32>
    %cst_77 = arith.constant 1.000000e+00 : f32
    %375 = vector.broadcast %cst_77 : f32 to vector<2x32xf32>
    %376 = arith.addf %375, %374 : vector<2x32xf32>
    %377 = arith.divf %375, %376 : vector<2x32xf32>
    %378 = vector.extract_strided_slice %271 {offsets = [6, 0], sizes = [2, 32], strides = [1, 1]} : vector<16x32xf32> to vector<2x32xf32>
    %379 = vector.extract_strided_slice %361 {offsets = [0, 64], sizes = [2, 32], strides = [1, 1]} : vector<2x96xf32> to vector<2x32xf32>
    %380 = arith.addf %379, %275 : vector<2x32xf32>
    %381 = arith.mulf %369, %380 : vector<2x32xf32>
    %382 = arith.addf %378, %381 : vector<2x32xf32>
    %383 = math.tanh %382 : vector<2x32xf32>
    %cst_78 = arith.constant 1.000000e+00 : f32
    %384 = vector.broadcast %cst_78 : f32 to vector<2x32xf32>
    %385 = arith.subf %384, %377 : vector<2x32xf32>
    %386 = arith.mulf %385, %383 : vector<2x32xf32>
    %387 = arith.mulf %377, %360 : vector<2x32xf32>
    %388 = arith.addf %386, %387 : vector<2x32xf32>
    %cst_79 = arith.constant dense<0.000000e+00> : vector<2x96xf32>
    %389 = tpu.matmul %388, %272, %cst_79 {dimension_numbers = #tpu.dot_dimension_numbers<[1], [0], [0], [1], [0, 0, 1, 1], [], []>} : vector<2x32xf32>, vector<32x96xf32>, vector<2x96xf32> -> vector<2x96xf32>
    %390 = vector.extract_strided_slice %269 {offsets = [8, 0], sizes = [2, 32], strides = [1, 1]} : vector<16x32xf32> to vector<2x32xf32>
    %391 = vector.extract_strided_slice %389 {offsets = [0, 0], sizes = [2, 32], strides = [1, 1]} : vector<2x96xf32> to vector<2x32xf32>
    %392 = arith.addf %390, %391 : vector<2x32xf32>
    %393 = arith.negf %392 : vector<2x32xf32>
    %394 = math.exp %393 : vector<2x32xf32>
    %cst_80 = arith.constant 1.000000e+00 : f32
    %395 = vector.broadcast %cst_80 : f32 to vector<2x32xf32>
    %396 = arith.addf %395, %394 : vector<2x32xf32>
    %397 = arith.divf %395, %396 : vector<2x32xf32>
    %398 = vector.extract_strided_slice %270 {offsets = [8, 0], sizes = [2, 32], strides = [1, 1]} : vector<16x32xf32> to vector<2x32xf32>
    %399 = vector.extract_strided_slice %389 {offsets = [0, 32], sizes = [2, 32], strides = [1, 1]} : vector<2x96xf32> to vector<2x32xf32>
    %400 = arith.addf %398, %399 : vector<2x32xf32>
    %401 = arith.negf %400 : vector<2x32xf32>
    %402 = math.exp %401 : vector<2x32xf32>
    %cst_81 = arith.constant 1.000000e+00 : f32
    %403 = vector.broadcast %cst_81 : f32 to vector<2x32xf32>
    %404 = arith.addf %403, %402 : vector<2x32xf32>
    %405 = arith.divf %403, %404 : vector<2x32xf32>
    %406 = vector.extract_strided_slice %271 {offsets = [8, 0], sizes = [2, 32], strides = [1, 1]} : vector<16x32xf32> to vector<2x32xf32>
    %407 = vector.extract_strided_slice %389 {offsets = [0, 64], sizes = [2, 32], strides = [1, 1]} : vector<2x96xf32> to vector<2x32xf32>
    %408 = arith.addf %407, %275 : vector<2x32xf32>
    %409 = arith.mulf %397, %408 : vector<2x32xf32>
    %410 = arith.addf %406, %409 : vector<2x32xf32>
    %411 = math.tanh %410 : vector<2x32xf32>
    %cst_82 = arith.constant 1.000000e+00 : f32
    %412 = vector.broadcast %cst_82 : f32 to vector<2x32xf32>
    %413 = arith.subf %412, %405 : vector<2x32xf32>
    %414 = arith.mulf %413, %411 : vector<2x32xf32>
    %415 = arith.mulf %405, %388 : vector<2x32xf32>
    %416 = arith.addf %414, %415 : vector<2x32xf32>
    %cst_83 = arith.constant dense<0.000000e+00> : vector<2x96xf32>
    %417 = tpu.matmul %416, %272, %cst_83 {dimension_numbers = #tpu.dot_dimension_numbers<[1], [0], [0], [1], [0, 0, 1, 1], [], []>} : vector<2x32xf32>, vector<32x96xf32>, vector<2x96xf32> -> vector<2x96xf32>
    %418 = vector.extract_strided_slice %269 {offsets = [10, 0], sizes = [2, 32], strides = [1, 1]} : vector<16x32xf32> to vector<2x32xf32>
    %419 = vector.extract_strided_slice %417 {offsets = [0, 0], sizes = [2, 32], strides = [1, 1]} : vector<2x96xf32> to vector<2x32xf32>
    %420 = arith.addf %418, %419 : vector<2x32xf32>
    %421 = arith.negf %420 : vector<2x32xf32>
    %422 = math.exp %421 : vector<2x32xf32>
    %cst_84 = arith.constant 1.000000e+00 : f32
    %423 = vector.broadcast %cst_84 : f32 to vector<2x32xf32>
    %424 = arith.addf %423, %422 : vector<2x32xf32>
    %425 = arith.divf %423, %424 : vector<2x32xf32>
    %426 = vector.extract_strided_slice %270 {offsets = [10, 0], sizes = [2, 32], strides = [1, 1]} : vector<16x32xf32> to vector<2x32xf32>
    %427 = vector.extract_strided_slice %417 {offsets = [0, 32], sizes = [2, 32], strides = [1, 1]} : vector<2x96xf32> to vector<2x32xf32>
    %428 = arith.addf %426, %427 : vector<2x32xf32>
    %429 = arith.negf %428 : vector<2x32xf32>
    %430 = math.exp %429 : vector<2x32xf32>
    %cst_85 = arith.constant 1.000000e+00 : f32
    %431 = vector.broadcast %cst_85 : f32 to vector<2x32xf32>
    %432 = arith.addf %431, %430 : vector<2x32xf32>
    %433 = arith.divf %431, %432 : vector<2x32xf32>
    %434 = vector.extract_strided_slice %271 {offsets = [10, 0], sizes = [2, 32], strides = [1, 1]} : vector<16x32xf32> to vector<2x32xf32>
    %435 = vector.extract_strided_slice %417 {offsets = [0, 64], sizes = [2, 32], strides = [1, 1]} : vector<2x96xf32> to vector<2x32xf32>
    %436 = arith.addf %435, %275 : vector<2x32xf32>
    %437 = arith.mulf %425, %436 : vector<2x32xf32>
    %438 = arith.addf %434, %437 : vector<2x32xf32>
    %439 = math.tanh %438 : vector<2x32xf32>
    %cst_86 = arith.constant 1.000000e+00 : f32
    %440 = vector.broadcast %cst_86 : f32 to vector<2x32xf32>
    %441 = arith.subf %440, %433 : vector<2x32xf32>
    %442 = arith.mulf %441, %439 : vector<2x32xf32>
    %443 = arith.mulf %433, %416 : vector<2x32xf32>
    %444 = arith.addf %442, %443 : vector<2x32xf32>
    %cst_87 = arith.constant dense<0.000000e+00> : vector<2x96xf32>
    %445 = tpu.matmul %444, %272, %cst_87 {dimension_numbers = #tpu.dot_dimension_numbers<[1], [0], [0], [1], [0, 0, 1, 1], [], []>} : vector<2x32xf32>, vector<32x96xf32>, vector<2x96xf32> -> vector<2x96xf32>
    %446 = vector.extract_strided_slice %269 {offsets = [12, 0], sizes = [2, 32], strides = [1, 1]} : vector<16x32xf32> to vector<2x32xf32>
    %447 = vector.extract_strided_slice %445 {offsets = [0, 0], sizes = [2, 32], strides = [1, 1]} : vector<2x96xf32> to vector<2x32xf32>
    %448 = arith.addf %446, %447 : vector<2x32xf32>
    %449 = arith.negf %448 : vector<2x32xf32>
    %450 = math.exp %449 : vector<2x32xf32>
    %cst_88 = arith.constant 1.000000e+00 : f32
    %451 = vector.broadcast %cst_88 : f32 to vector<2x32xf32>
    %452 = arith.addf %451, %450 : vector<2x32xf32>
    %453 = arith.divf %451, %452 : vector<2x32xf32>
    %454 = vector.extract_strided_slice %270 {offsets = [12, 0], sizes = [2, 32], strides = [1, 1]} : vector<16x32xf32> to vector<2x32xf32>
    %455 = vector.extract_strided_slice %445 {offsets = [0, 32], sizes = [2, 32], strides = [1, 1]} : vector<2x96xf32> to vector<2x32xf32>
    %456 = arith.addf %454, %455 : vector<2x32xf32>
    %457 = arith.negf %456 : vector<2x32xf32>
    %458 = math.exp %457 : vector<2x32xf32>
    %cst_89 = arith.constant 1.000000e+00 : f32
    %459 = vector.broadcast %cst_89 : f32 to vector<2x32xf32>
    %460 = arith.addf %459, %458 : vector<2x32xf32>
    %461 = arith.divf %459, %460 : vector<2x32xf32>
    %462 = vector.extract_strided_slice %271 {offsets = [12, 0], sizes = [2, 32], strides = [1, 1]} : vector<16x32xf32> to vector<2x32xf32>
    %463 = vector.extract_strided_slice %445 {offsets = [0, 64], sizes = [2, 32], strides = [1, 1]} : vector<2x96xf32> to vector<2x32xf32>
    %464 = arith.addf %463, %275 : vector<2x32xf32>
    %465 = arith.mulf %453, %464 : vector<2x32xf32>
    %466 = arith.addf %462, %465 : vector<2x32xf32>
    %467 = math.tanh %466 : vector<2x32xf32>
    %cst_90 = arith.constant 1.000000e+00 : f32
    %468 = vector.broadcast %cst_90 : f32 to vector<2x32xf32>
    %469 = arith.subf %468, %461 : vector<2x32xf32>
    %470 = arith.mulf %469, %467 : vector<2x32xf32>
    %471 = arith.mulf %461, %444 : vector<2x32xf32>
    %472 = arith.addf %470, %471 : vector<2x32xf32>
    %cst_91 = arith.constant dense<0.000000e+00> : vector<2x96xf32>
    %473 = tpu.matmul %472, %272, %cst_91 {dimension_numbers = #tpu.dot_dimension_numbers<[1], [0], [0], [1], [0, 0, 1, 1], [], []>} : vector<2x32xf32>, vector<32x96xf32>, vector<2x96xf32> -> vector<2x96xf32>
    %474 = vector.extract_strided_slice %269 {offsets = [14, 0], sizes = [2, 32], strides = [1, 1]} : vector<16x32xf32> to vector<2x32xf32>
    %475 = vector.extract_strided_slice %473 {offsets = [0, 0], sizes = [2, 32], strides = [1, 1]} : vector<2x96xf32> to vector<2x32xf32>
    %476 = arith.addf %474, %475 : vector<2x32xf32>
    %477 = arith.negf %476 : vector<2x32xf32>
    %478 = math.exp %477 : vector<2x32xf32>
    %cst_92 = arith.constant 1.000000e+00 : f32
    %479 = vector.broadcast %cst_92 : f32 to vector<2x32xf32>
    %480 = arith.addf %479, %478 : vector<2x32xf32>
    %481 = arith.divf %479, %480 : vector<2x32xf32>
    %482 = vector.extract_strided_slice %270 {offsets = [14, 0], sizes = [2, 32], strides = [1, 1]} : vector<16x32xf32> to vector<2x32xf32>
    %483 = vector.extract_strided_slice %473 {offsets = [0, 32], sizes = [2, 32], strides = [1, 1]} : vector<2x96xf32> to vector<2x32xf32>
    %484 = arith.addf %482, %483 : vector<2x32xf32>
    %485 = arith.negf %484 : vector<2x32xf32>
    %486 = math.exp %485 : vector<2x32xf32>
    %cst_93 = arith.constant 1.000000e+00 : f32
    %487 = vector.broadcast %cst_93 : f32 to vector<2x32xf32>
    %488 = arith.addf %487, %486 : vector<2x32xf32>
    %489 = arith.divf %487, %488 : vector<2x32xf32>
    %490 = vector.extract_strided_slice %271 {offsets = [14, 0], sizes = [2, 32], strides = [1, 1]} : vector<16x32xf32> to vector<2x32xf32>
    %491 = vector.extract_strided_slice %473 {offsets = [0, 64], sizes = [2, 32], strides = [1, 1]} : vector<2x96xf32> to vector<2x32xf32>
    %492 = arith.addf %491, %275 : vector<2x32xf32>
    %493 = arith.mulf %481, %492 : vector<2x32xf32>
    %494 = arith.addf %490, %493 : vector<2x32xf32>
    %495 = math.tanh %494 : vector<2x32xf32>
    %cst_94 = arith.constant 1.000000e+00 : f32
    %496 = vector.broadcast %cst_94 : f32 to vector<2x32xf32>
    %497 = arith.subf %496, %489 : vector<2x32xf32>
    %498 = arith.mulf %497, %495 : vector<2x32xf32>
    %499 = arith.mulf %489, %472 : vector<2x32xf32>
    %500 = arith.addf %498, %499 : vector<2x32xf32>
    %cst_95 = arith.constant 0.000000e+00 : f32
    %501 = vector.broadcast %cst_95 : f32 to vector<2x32xf32>
    %502 = arith.maximumf %500, %501 : vector<2x32xf32>
    %c0_96 = arith.constant 0 : index
    %c0_97 = arith.constant 0 : index
    %503 = vector.load %arg9[%c0_96, %c0_97] : memref<32x128xf32, #tpu.memory_space<vmem>>, vector<32x128xf32>
    %cst_98 = arith.constant dense<0.000000e+00> : vector<2x128xf32>
    %504 = tpu.matmul %502, %503, %cst_98 {dimension_numbers = #tpu.dot_dimension_numbers<[1], [0], [0], [1], [0, 0, 1, 1], [], []>} : vector<2x32xf32>, vector<32x128xf32>, vector<2x128xf32> -> vector<2x128xf32>
    %c0_99 = arith.constant 0 : index
    %c0_100 = arith.constant 0 : index
    %505 = vector.load %arg10[%c0_99, %c0_100] : memref<1x128xf32, #tpu.memory_space<vmem>>, vector<1x128xf32>
    %506 = vector.broadcast %505 : vector<1x128xf32> to vector<2x128xf32>
    %507 = arith.addf %504, %506 : vector<2x128xf32>
    %cst_101 = arith.constant 0.000000e+00 : f32
    %508 = vector.broadcast %cst_101 : f32 to vector<2x128xf32>
    %509 = arith.maximumf %507, %508 : vector<2x128xf32>
    %c0_102 = arith.constant 0 : index
    %c0_103 = arith.constant 0 : index
    %510 = vector.load %arg11[%c0_102, %c0_103] : memref<128x5xf32, #tpu.memory_space<vmem>>, vector<128x5xf32>
    %cst_104 = arith.constant dense<0.000000e+00> : vector<2x5xf32>
    %511 = tpu.matmul %509, %510, %cst_104 {dimension_numbers = #tpu.dot_dimension_numbers<[1], [0], [0], [1], [0, 0, 1, 1], [], []>} : vector<2x128xf32>, vector<128x5xf32>, vector<2x5xf32> -> vector<2x5xf32>
    %c0_105 = arith.constant 0 : index
    %c0_106 = arith.constant 0 : index
    %512 = vector.load %arg12[%c0_105, %c0_106] : memref<1x5xf32, #tpu.memory_space<vmem>>, vector<1x5xf32>
    %513 = vector.broadcast %512 : vector<1x5xf32> to vector<2x5xf32>
    %514 = arith.addf %511, %513 : vector<2x5xf32>
    %c0_107 = arith.constant 0 : index
    %c0_108 = arith.constant 0 : index
    %515 = vector.load %arg13[%c0_107, %c0_108] : memref<2x5xf32, #tpu.memory_space<vmem>>, vector<2x5xf32>
    tpu.vector_store %arg13[%c0_107, %c0_108], %514 {strides = array<i32>} : memref<2x5xf32, #tpu.memory_space<vmem>>, vector<2x5xf32>,
    return
  }
}

</mosaic_0001>

<bundles_post_ra>
// kernel: gru_model_forward.1
= control target key start
LH: loop header
LB: loop body
LE: loop exit
PB: predicated region body
PF: predicated region fallthrough
CT: control target
= control target key end

     0   :  { %18 = vsyncpa [#allocation4], 0  ;;  %s3445_s0 = inlined_call_operand.hbm [shape: f32[16,16], index: 0, kind: input, shape index: {}]   ;;  %s3446_s1 = inlined_call_operand.hbm [shape: f32[16,96], index: 1, kind: input, shape index: {}]   ;;  %s3447_s2 = inlined_call_operand.vmem [shape: f32[32,96], index: 2, kind: input, shape index: {}]   ;;  %s3448_s3 = inlined_call_operand.vmem [shape: f32[1,96], index: 3, kind: input, shape index: {}]   ;;  %s3449_s4 = inlined_call_operand.vmem [shape: f32[1,32], index: 4, kind: input, shape index: {}]   ;;  %s3450_s5 = inlined_call_operand.vmem [shape: f32[32,96], index: 5, kind: input, shape index: {}]   ;;  %s3451_s6 = inlined_call_operand.vmem [shape: f32[32,96], index: 6, kind: input, shape index: {}]   ;;  %s3452_s7 = inlined_call_operand.vmem [shape: f32[1,96], index: 7, kind: input, shape index: {}]   ;;  %s3453_s8 = inlined_call_operand.vmem [shape: f32[1,32], index: 8, kind: input, shape index: {}]   ;;  %s3454_s9 = inlined_call_operand.vmem [shape: f32[32,128], index: 9, kind: input, shape index: {}]   ;;  %s3455_s10 = inlined_call_operand.vmem [shape: f32[1,128], index: 10, kind: input, shape index: {}]   ;;  %s3456_s11 = inlined_call_operand.vmem [shape: f32[128,5], index: 11, kind: input, shape index: {}]   ;;  %s3457_s12 = inlined_call_operand.vmem [shape: f32[1,5], index: 12, kind: input, shape index: {}]   ;;  %s3458_s13 = inlined_call_operand.hbm [shape: f32[2,5], index: 13, kind: output, shape index: {}]  }
   0x1   :  { %19 = vsyncpa [#allocation7], 0 }
   0x2   :  { %20 = vsyncpa [#allocation5], 0  ;;  %s2844_s25 = smov [#allocation3]  }
   0x3   :  { %s26_s26 = sshll.u32 %s2844_s25, 4  ;;  %s27_s26 = int_to_ptr.vmem [resolvable:$true] %s26_s26 }
   0x4   :  { %s2786_s27 = scalar_lea.vmem %s27_s26, 256  ;;  %p2791_p1 = scmp.lt.s32.totalorder %s27_s26, %s27_s26 }
   0x5   :  { %p2787_p0 = scmp.ne.s32.totalorder %s27_s26, %s2786_s27  ;;  %p2792_p2 = scmp.lt.s32.totalorder %s2786_s27, %s2786_s27 }
   0x7   :  { %p2793_p3 = por %p2792_p2, %p2791_p1 }
   0x9   :  { %p2794_p4 = pnand %p2793_p3, %p2787_p0 }
   0xb   :  { %2797 = shalt.err (!%p2794_p4)
}
   0xc   :  { %s2845_s28 = smov 128   ;;  %s2846_s29 = smov 8  }
   0xd   :  { %32 = dma.hbm_to_vmem [thread:$0]  %s3445_s0, 256, %s27_s26, [#allocation4], %s2845_s28, %s2845_s28, %s2846_s29  }
   0xe   :  { %s2847_s15 = smov [#allocation6]  }
   0xf   :  { %s38_s16 = sshll.u32 %s2847_s15, 4  ;;  %s39_s16 = int_to_ptr.vmem [resolvable:$true] %s38_s16 }
  0x10   :  { %s2806_s17 = scalar_lea.vmem %s39_s16, 256  ;;  %p2811_p6 = scmp.lt.s32.totalorder %s39_s16, %s39_s16 }
  0x11   :  { %p2807_p5 = scmp.ne.s32.totalorder %s39_s16, %s2806_s17  ;;  %p2812_p7 = scmp.lt.s32.totalorder %s2806_s17, %s2806_s17 }
  0x13   :  { %p2813_p8 = por %p2812_p7, %p2811_p6 }
  0x15   :  { %p2814_p9 = pnand %p2813_p8, %p2807_p5 }
  0x17   :  { %2817 = shalt.err (!%p2814_p9)
}
  0x18   :  { %44 = dma.hbm_to_vmem [thread:$0]  %s3446_s1, 256, %s39_s16, [#allocation7], %s2845_s28, %s2845_s28, %s2846_s29  }
  0x19   :  { %2838 = dma.done.wait [#allocation4], 256  }
  0x1a   :  { %2839 = vsyncadd [#allocation4], 4294967040 }
  0x1b   :  { %2840 = dma.done.wait [#allocation7], 256  }
  0x1c   :  { %2841 = vsyncadd [#allocation7], 4294967040  ;;  %v2848_v0 = vmov 0.0   ;;  %vm2849_vm0 = vmmov 0   ;;  %v127_v1 = vld [vmem:[#allocation6 + $0x8] sm:$0xff]  ;;  %v126_v2 = vld [vmem:[#allocation6] sm:$0xff] }
  0x1d   :  { %2484 = vmatprep.subr.mxu1 %v2848_v0  ;;  %2492 = vmatprep.mubr.msk.f32.mxu1 %vm2849_vm0, %v2848_v0  ;;  %v73_v3 = vld [vmem:[#allocation3] sm:$0xff]  ;;  %vm105_vm1 = vcmask 1040384   ;;  %v74_v4 = vld [vmem:[#allocation3 + $0x8] sm:$0xff]  ;;  %vm107_vm2 = vcmask 1041408   ;;  %vm109_vm3 = vcmask 1042432   ;;  %vm111_vm4 = vcmask 1043456  }
  0x1e   :  { %2433 = vmatprep.subr.mxu0 %v127_v1  ;;  %v79_v5 = vrot.slane %v73_v3, 7  ;;  %v91_v6 = vrot.slane %v73_v3, 4  ;;  %v2935_v7 = vld [vmem:[%s3447_s2 + $0x18] sm:$0xff]  ;;  %v76_v8 = vrot.slane %v74_v4, 7  ;;  %v81_v9 = vrot.slane %v74_v4, 6  ;;  %v2941_v14 = vld [vmem:[%s3447_s2 + $0x10] sm:$0xff] }
  0x1f   :  { %2434 = vmatpush3.msra.mxu0 %v127_v1  ;;  %vm113_vm5 = vcmask 1044480   ;;  %2485 = vmatpush3.msra.mxu1 %v2935_v7  ;;  %v83_v10 = vrot.slane %v73_v3, 6  ;;  %v93_v11 = vrot.slane %v74_v4, 3  ;;  %v95_v12 = vrot.slane %v73_v3, 3  ;;  %v2283_v18 = vld [vmem:[%s3449_s4] ss:$0 sm:$0xff] }
  0x20   :  { %2435 = vmatprep.subr.mxu0 %v126_v2  ;;  %v97_v13 = vrot.slane %v74_v4, 2  ;;  %2486 = vmatprep.subr.mxu1 %v2848_v0  ;;  %v85_v15 = vrot.slane %v74_v4, 5  ;;  %v106_v16 = vsel %vm105_vm1, %v73_v3, %v76_v8  ;;  %vm115_vm6 = vcmask 1045504   ;;  %s2850_s24 = smov 64   ;;  %v2958_v27 = vld [vmem:[%s3447_s2 + $0x8] sm:$0xff]  ;;  %v2969_v32 = vld [vmem:[%s3447_s2] sm:$0xff] }
  0x21   :  { %2436 = vmatpush3.msra.mxu0 %v126_v2  ;;  %v99_v17 = vrot.slane %v73_v3, 2  ;;  %2487 = vmatpush3.msra.mxu1 %v2941_v14  ;;  %v87_v19 = vrot.slane %v73_v3, 5  ;;  %v108_v20 = vsel %vm107_vm2, %v106_v16, %v79_v5  ;;  %v101_v21 = vrot.slane %v74_v4, 1  ;;  %v2280_v38 = vld [vmem:[%s3448_s3] ss:$0 sm:$0xff]  ;;  %s2851_s3 = smov 96  }
  0x22   :  { %2440 = vmatprep.subr.mxu0 %v2848_v0  ;;  %v119_v22 = vsel %vm105_vm1, %v91_v6, %v93_v11  ;;  %308 = vrot.lane.b32.xlu0 %v2283_v18, %s2850_s24  ;;  %v89_v23 = vrot.slane %v74_v4, 4  ;;  %v110_v24 = vsel %vm109_vm3, %v108_v20, %v81_v9  ;;  %v103_v25 = vrot.slane %v73_v3, 1  ;;  %s2852_s20 = smov [#allocation8]  }
  0x23   :  { %v120_v26 = vsel %vm107_vm2, %v119_v22, %v95_v12  ;;  %2488 = vmatprep.subr.mxu1 %v2848_v0  ;;  %v112_v28 = vsel %vm111_vm4, %v110_v24, %v83_v10  ;;  %vm117_vm7 = vcmask 1046528   ;;  %vm135_vm8 = vcmask 130048   ;;  %s2270_s21 = sshll.u32 %s2852_s20, 4  ;;  %s2271_s21 = int_to_ptr.vmem [resolvable:$true] %s2270_s21 }
  0x24   :  { %v121_v29 = vsel %vm109_vm3, %v120_v26, %v97_v13  ;;  %2489 = vmatpush3.msra.mxu1 %v2958_v27  ;;  %v114_v30 = vsel %vm113_vm5, %v112_v28, %v85_v15  ;;  %vm335_vm9 = vcmask 254976   ;;  %vm227_vm10 = vcmask 261120   ;;  %p2823_p11 = scmp.lt.s32.totalorder %s2271_s21, %s2271_s21 }
  0x25   :  { %v122_v31 = vsel %vm111_vm4, %v121_v29, %v99_v17  ;;  %2490 = vmatprep.subr.mxu1 %v2848_v0  ;;  %v116_v33 = vsel %vm115_vm6, %v114_v30, %v87_v19  ;;  %vm446_vm11 = vcmask 257026   ;;  %vm674_vm12 = vcmask 261126  }
  0x26   :  { %v123_v34 = vsel %vm113_vm5, %v122_v31, %v101_v21  ;;  %2491 = vmatpush3.msra.mxu1 %v2969_v32  ;;  %v118_v35 = vsel %vm117_vm7, %v116_v33, %v89_v23  ;;  %vm560_vm13 = vcmask 259076   ;;  %vm2262_vm14 = vcmask 33792  }
  0x27   :  { %v124_v36 = vsel %vm115_vm6, %v123_v34, %v103_v25  ;;  %2506 = vmatprep.subr.mxu1 %v2848_v0  ;;  %2437 = vmatprep.mubr.msk.f32.mxu0 %vm135_vm8, %v118_v35 }
  0x28   :  { %v125_v37 = vsel %vm117_vm7, %v124_v36, %v74_v4 }
  0x29   :  { %2438 = vmatmul.mubr.msk.f32.vlgmr.msra.gmra.mxu0 %vm135_vm8, %v125_v37 }
  0x2a   :  { %2441 = vmatpush3.msra.mxu0 %v2935_v7  ;;  %2448 = vmatprep.mubr.msk.f32.mxu0 %vm2849_vm0, %v2848_v0 }
  0x2b   :  { %2442 = vmatprep.subr.mxu0 %v2848_v0 }
  0x2c   :  { %2443 = vmatpush3.msra.mxu0 %v2941_v14 }
  0x2d   :  { %2444 = vmatprep.subr.mxu0 %v2848_v0 }
  0x2e   :  { %2445 = vmatpush3.msra.mxu0 %v2958_v27 }
  0x2f   :  { %2446 = vmatprep.subr.mxu0 %v2848_v0 }
  0x30   :  { %2447 = vmatpush3.msra.mxu0 %v2969_v32 }
  0x31   :  { %2449 = vmatmul.mubr.f32.vlgmr.msra.gmra.mxu0 %v2848_v0  ;;  %2451 = vmatprep.subr.mxu0 %v2848_v0 }
  0x32   :  { %2452 = vmatpush3.msra.mxu0 %v2935_v7  ;;  %2459 = vmatprep.mubr.msk.f32.mxu0 %vm2849_vm0, %v2848_v0 }
  0x33   :  { %2453 = vmatprep.subr.mxu0 %v2848_v0 }
  0x34   :  { %2454 = vmatpush3.msra.mxu0 %v2941_v14 }
  0x35   :  { %2455 = vmatprep.subr.mxu0 %v2848_v0 }
  0x36   :  { %2456 = vmatpush3.msra.mxu0 %v2958_v27 }
  0x37   :  { %2457 = vmatprep.subr.mxu0 %v2848_v0 }
  0x38   :  { %2458 = vmatpush3.msra.mxu0 %v2969_v32 }
  0x39   :  { %2462 = vmatprep.subr.mxu0 %v2848_v0 }
  0x94   :  { %v3003_v42 = vpop.permute.xlu0 %308 }
  0xe9   :  { %v2439_v39 = vpop.f32.mrf.mxu0 }
  0xea   :  { %v3001_v40 = vadd.f32 %v2439_v39, %v2280_v38 }
  0xeb   :  { %v208_v41 = vpop.f32.mrf.mxu0 }
  0xec   :  { %v3007_v46 = vadd.f32 %v2280_v38, %v208_v41 }
  0xf1   :  { %v297_v43 = vpop.f32.mrf.mxu0 }
  0xf2   :  { %v311_v44 = vadd.f32 %v3003_v42, %v297_v43  ;;  %v301_v47 = vadd.f32 %v297_v43, %v3007_v46 }
  0xf3   :  { %v2450_v45 = vpop.f32.mrf.mxu0 }
  0xf4   :  { %313 = vrot.lane.b32.xlu0 %v311_v44, %s2850_s24  ;;  %v2284_v48 = vmul.f32 -1.442695, %v301_v47 }
  0xf6   :  { %2682 = vpow2.f32 %v2284_v48 }
 0x103   :  { %v2683_v49 = vpop.eup %2682 }
 0x104   :  { %v305_v50 = vadd.f32 1.0, %v2683_v49 }
 0x106   :  { %2684 = vrcp.f32 %v305_v50 }
 0x113   :  { %v2685_v51 = vpop.eup %2684 }
 0x114   :  { %v323_v57 = vsub.f32 1.0, %v2685_v51  ;;  %v329_v59 = vmul.f32 0.0, %v2685_v51 }
 0x166   :  { %v314_v52 = vpop.permute.xlu0 %313 }
 0x167   :  { %v316_v53 = vmul.f32 %v2685_v51, %v314_v52 }
 0x169   :  { %318 = vrot.lane.b32.xlu1 %v316_v53, %s2850_s24 }
 0x1db   :  { %v319_v54 = vpop.permute.xlu1 %318 }
 0x1dc   :  { %v321_v55 = vadd.f32 %v319_v54, %v3007_v46 }
 0x1de   :  { %2686 = vtanh.f32 %v321_v55 }
 0x1eb   :  { %v2687_v56 = vpop.eup %2686 }
 0x1ec   :  { %325 = vrot.lane.b32.xlu1 %v2687_v56, %s2851_s3 }
 0x25e   :  { %v326_v58 = vpop.permute.xlu1 %325 }
 0x25f   :  { %v328_v60 = vmul.f32 %v326_v58, %v323_v57 }
 0x261   :  { %v330_v61 = vadd.f32 %v329_v59, %v328_v60 }
 0x263   :  { %332 = vrot.lane.b32.xlu0 %v330_v61, %s2851_s3  ;;  %v438_v17 = vrot.slane %v330_v61, 6 }
 0x2d5   :  { %v333_v62 = vpop.permute.xlu0 %332 }
 0x2d6   :  { %336 = vst.msk [vmem:[#allocation2] sm:$0x3] %vm335_vm9, %v333_v62  ;;  %2460 = vmatmul.mubr.msk.f32.vlgmr.msra.gmra.mxu0 %vm227_vm10, %v333_v62 }
 0x2d7   :  { %2463 = vmatpush3.msra.mxu0 %v2935_v7  ;;  %2470 = vmatprep.mubr.msk.f32.mxu0 %vm2849_vm0, %v2848_v0 }
 0x2d8   :  { %2464 = vmatprep.subr.mxu0 %v2848_v0 }
 0x2d9   :  { %2465 = vmatpush3.msra.mxu0 %v2941_v14 }
 0x2da   :  { %2466 = vmatprep.subr.mxu0 %v2848_v0 }
 0x2db   :  { %2467 = vmatpush3.msra.mxu0 %v2958_v27 }
 0x2dc   :  { %2468 = vmatprep.subr.mxu0 %v2848_v0 }
 0x2dd   :  { %2469 = vmatpush3.msra.mxu0 %v2969_v32 }
 0x2de   :  { %2473 = vmatprep.subr.mxu0 %v2848_v0 }
 0x396   :  { %v405_v63 = vpop.f32.mrf.mxu0 }
 0x397   :  { %v419_v1 = vadd.f32 %v405_v63, %v3003_v42  ;;  %v410_v4 = vrot.slane %v405_v63, 6 }
 0x398   :  { %v2461_v2 = vpop.f32.mrf.mxu0 }
 0x399   :  { %v421_v3 = vrot.slane %v419_v1, 6  ;;  %v412_v5 = vadd.f32 %v410_v4, %v3007_v46 }
 0x39b   :  { %422 = vrot.lane.b32.xlu1 %v421_v3, %s2850_s24  ;;  %v2286_v6 = vmul.f32 -1.442695, %v412_v5 }
 0x39d   :  { %2688 = vpow2.f32 %v2286_v6 }
 0x3aa   :  { %v2689_v8 = vpop.eup %2688 }
 0x3ab   :  { %v416_v9 = vadd.f32 1.0, %v2689_v8 }
 0x3ad   :  { %2690 = vrcp.f32 %v416_v9 }
 0x3ba   :  { %v2691_v10 = vpop.eup %2690 }
 0x3bb   :  { %v432_v18 = vsub.f32 1.0, %v2691_v10  ;;  %v440_v21 = vmul.f32 %v2691_v10, %v438_v17 }
 0x40d   :  { %v423_v11 = vpop.permute.xlu1 %422 }
 0x40e   :  { %v425_v12 = vmul.f32 %v2691_v10, %v423_v11 }
 0x410   :  { %427 = vrot.lane.b32.xlu0 %v425_v12, %s2850_s24 }
 0x482   :  { %v428_v13 = vpop.permute.xlu0 %427 }
 0x483   :  { %v430_v15 = vadd.f32 %v428_v13, %v3007_v46 }
 0x485   :  { %2692 = vtanh.f32 %v430_v15 }
 0x492   :  { %v2693_v16 = vpop.eup %2692 }
 0x493   :  { %434 = vrot.lane.b32.xlu1 %v2693_v16, %s2851_s3 }
 0x505   :  { %v435_v19 = vpop.permute.xlu1 %434 }
 0x506   :  { %v437_v20 = vmul.f32 %v435_v19, %v432_v18 }
 0x508   :  { %v3032_v22 = vadd.f32 %v440_v21, %v437_v20 }
 0x50a   :  { %v448_v23 = vrot.slane %v3032_v22, 2  ;;  %v552_v45 = vrot.slane %v3032_v22, 6 }
 0x50c   :  { %449 = vrot.lane.b32.xlu0 %v448_v23, %s2851_s3 }
 0x57e   :  { %v450_v24 = vpop.permute.xlu0 %449 }
 0x57f   :  { %2471 = vmatmul.mubr.msk.f32.vlgmr.msra.gmra.mxu0 %vm227_vm10, %v450_v24 }
 0x580   :  { %2474 = vmatpush3.msra.mxu0 %v2935_v7  ;;  %2481 = vmatprep.mubr.msk.f32.mxu0 %vm2849_vm0, %v2848_v0 }
 0x581   :  { %2475 = vmatprep.subr.mxu0 %v2848_v0 }
 0x582   :  { %2476 = vmatpush3.msra.mxu0 %v2941_v14 }
 0x583   :  { %2477 = vmatprep.subr.mxu0 %v2848_v0 }
 0x584   :  { %2478 = vmatpush3.msra.mxu0 %v2958_v27 }
 0x585   :  { %2479 = vmatprep.subr.mxu0 %v2848_v0 }
 0x586   :  { %2480 = vmatpush3.msra.mxu0 %v2969_v32 }
 0x587   :  { %2495 = vmatprep.subr.mxu0 %v2848_v0 }
 0x63f   :  { %v519_v25 = vpop.f32.mrf.mxu0 }
 0x640   :  { %v533_v26 = vadd.f32 %v519_v25, %v3003_v42  ;;  %v524_v30 = vrot.slane %v519_v25, 4 }
 0x641   :  { %v2472_v28 = vpop.f32.mrf.mxu0 }
 0x642   :  { %v535_v29 = vrot.slane %v533_v26, 4  ;;  %v526_v31 = vadd.f32 %v524_v30, %v3007_v46 }
 0x644   :  { %536 = vrot.lane.b32.xlu1 %v535_v29, %s2850_s24  ;;  %v2288_v33 = vmul.f32 -1.442695, %v526_v31 }
 0x646   :  { %2694 = vpow2.f32 %v2288_v33 }
 0x653   :  { %v2695_v34 = vpop.eup %2694 }
 0x654   :  { %v530_v35 = vadd.f32 1.0, %v2695_v34 }
 0x656   :  { %2696 = vrcp.f32 %v530_v35 }
 0x663   :  { %v2697_v36 = vpop.eup %2696 }
 0x664   :  { %v546_v44 = vsub.f32 1.0, %v2697_v36  ;;  %v554_v48 = vmul.f32 %v2697_v36, %v552_v45 }
 0x6b6   :  { %v537_v37 = vpop.permute.xlu1 %536 }
 0x6b7   :  { %v539_v38 = vmul.f32 %v2697_v36, %v537_v37 }
 0x6b9   :  { %541 = vrot.lane.b32.xlu0 %v539_v38, %s2850_s24 }
 0x72b   :  { %v542_v39 = vpop.permute.xlu0 %541 }
 0x72c   :  { %v544_v41 = vadd.f32 %v542_v39, %v3007_v46 }
 0x72e   :  { %2698 = vtanh.f32 %v544_v41 }
 0x73b   :  { %v2699_v43 = vpop.eup %2698 }
 0x73c   :  { %548 = vrot.lane.b32.xlu1 %v2699_v43, %s2851_s3 }
 0x7ae   :  { %v549_v47 = vpop.permute.xlu1 %548 }
 0x7af   :  { %v551_v49 = vmul.f32 %v549_v47, %v546_v44 }
 0x7b1   :  { %v3054_v50 = vadd.f32 %v554_v48, %v551_v49 }
 0x7b3   :  { %v562_v51 = vrot.slane %v3054_v50, 4  ;;  %v666_v6 = vrot.slane %v3054_v50, 6 }
 0x7b5   :  { %563 = vrot.lane.b32.xlu0 %v562_v51, %s2851_s3 }
 0x827   :  { %v564_v52 = vpop.permute.xlu0 %563 }
 0x828   :  { %2482 = vmatmul.mubr.msk.f32.vlgmr.msra.gmra.mxu0 %vm227_vm10, %v564_v52 }
 0x829   :  { %2496 = vmatpush3.msra.mxu0 %v2935_v7  ;;  %2503 = vmatprep.mubr.msk.f32.mxu0 %vm2849_vm0, %v2848_v0 }
 0x82a   :  { %2497 = vmatprep.subr.mxu0 %v2848_v0 }
 0x82b   :  { %2498 = vmatpush3.msra.mxu0 %v2941_v14 }
 0x82c   :  { %2499 = vmatprep.subr.mxu0 %v2848_v0 }
 0x82d   :  { %2500 = vmatpush3.msra.mxu0 %v2958_v27 }
 0x82e   :  { %2501 = vmatprep.subr.mxu0 %v2848_v0 }
 0x82f   :  { %2502 = vmatpush3.msra.mxu0 %v2969_v32 }
 0x830   :  { %2517 = vmatprep.subr.mxu0 %v2848_v0 }
 0x8e8   :  { %v633_v53 = vpop.f32.mrf.mxu0 }
 0x8e9   :  { %v647_v54 = vadd.f32 %v633_v53, %v3003_v42  ;;  %v638_v57 = vrot.slane %v633_v53, 2 }
 0x8ea   :  { %v2483_v55 = vpop.f32.mrf.mxu0 }
 0x8eb   :  { %v649_v56 = vrot.slane %v647_v54, 2  ;;  %v640_v58 = vadd.f32 %v638_v57, %v3007_v46 }
 0x8ed   :  { %650 = vrot.lane.b32.xlu1 %v649_v56, %s2850_s24  ;;  %v2290_v59 = vmul.f32 -1.442695, %v640_v58 }
 0x8ef   :  { %2700 = vpow2.f32 %v2290_v59 }
 0x8fc   :  { %v2701_v60 = vpop.eup %2700 }
 0x8fd   :  { %v644_v61 = vadd.f32 1.0, %v2701_v60 }
 0x8ff   :  { %2702 = vrcp.f32 %v644_v61 }
 0x90c   :  { %v2703_v62 = vpop.eup %2702 }
 0x90d   :  { %v660_v5 = vsub.f32 1.0, %v2703_v62  ;;  %v668_v9 = vmul.f32 %v2703_v62, %v666_v6 }
 0x95f   :  { %v651_v63 = vpop.permute.xlu1 %650 }
 0x960   :  { %v653_v1 = vmul.f32 %v2703_v62, %v651_v63 }
 0x962   :  { %655 = vrot.lane.b32.xlu0 %v653_v1, %s2850_s24 }
 0x9d4   :  { %v656_v2 = vpop.permute.xlu0 %655 }
 0x9d5   :  { %v658_v3 = vadd.f32 %v656_v2, %v3007_v46 }
 0x9d7   :  { %2704 = vtanh.f32 %v658_v3 }
 0x9e4   :  { %v2705_v4 = vpop.eup %2704 }
 0x9e5   :  { %662 = vrot.lane.b32.xlu1 %v2705_v4, %s2851_s3 }
 0xa57   :  { %v663_v8 = vpop.permute.xlu1 %662 }
 0xa58   :  { %v665_v10 = vmul.f32 %v663_v8, %v660_v5 }
 0xa5a   :  { %v3076_v11 = vadd.f32 %v668_v9, %v665_v10 }
 0xa5c   :  { %v676_v12 = vrot.slane %v3076_v11, 6 }
 0xa5e   :  { %677 = vrot.lane.b32.xlu0 %v676_v12, %s2851_s3 }
 0xad0   :  { %v678_v13 = vpop.permute.xlu0 %677 }
 0xad1   :  { %2493 = vmatmul.mubr.msk.f32.vlgmr.msra.gmra.mxu1 %vm227_vm10, %v678_v13 }
 0xad2   :  { %2507 = vmatpush3.msra.mxu1 %v2935_v7  ;;  %2514 = vmatprep.mubr.msk.f32.mxu1 %vm2849_vm0, %v2848_v0 }
 0xad3   :  { %2508 = vmatprep.subr.mxu1 %v2848_v0 }
 0xad4   :  { %2509 = vmatpush3.msra.mxu1 %v2941_v14 }
 0xad5   :  { %2510 = vmatprep.subr.mxu1 %v2848_v0 }
 0xad6   :  { %2511 = vmatpush3.msra.mxu1 %v2958_v27 }
 0xad7   :  { %2512 = vmatprep.subr.mxu1 %v2848_v0 }
 0xad8   :  { %2513 = vmatpush3.msra.mxu1 %v2969_v32 }
 0xb91   :  { %v747_v46 = vpop.f32.mrf.mxu1 }
 0xb92   :  { %v758_v15 = vadd.f32 %v747_v46, %v3003_v42  ;;  %v751_v17 = vadd.f32 %v747_v46, %v3001_v40 }
 0xb93   :  { %v2494_v16 = vpop.f32.mrf.mxu1 }
 0xb94   :  { %760 = vrot.lane.b32.xlu1 %v758_v15, %s2850_s24  ;;  %v2292_v18 = vmul.f32 -1.442695, %v751_v17 }
 0xb96   :  { %2706 = vpow2.f32 %v2292_v18 }
 0xba3   :  { %v2707_v19 = vpop.eup %2706 }
 0xba4   :  { %v755_v20 = vadd.f32 1.0, %v2707_v19 }
 0xba6   :  { %2708 = vrcp.f32 %v755_v20 }
 0xbb3   :  { %v2709_v21 = vpop.eup %2708 }
 0xbb4   :  { %v770_v29 = vsub.f32 1.0, %v2709_v21  ;;  %v777_v31 = vmul.f32 %v2709_v21, %v676_v12 }
 0xc06   :  { %v761_v23 = vpop.permute.xlu1 %760 }
 0xc07   :  { %v763_v24 = vmul.f32 %v2709_v21, %v761_v23 }
 0xc09   :  { %765 = vrot.lane.b32.xlu0 %v763_v24, %s2850_s24 }
 0xc7b   :  { %v766_v25 = vpop.permute.xlu0 %765 }
 0xc7c   :  { %v768_v26 = vadd.f32 %v766_v25, %v3001_v40 }
 0xc7e   :  { %2710 = vtanh.f32 %v768_v26 }
 0xc8b   :  { %v2711_v28 = vpop.eup %2710 }
 0xc8c   :  { %772 = vrot.lane.b32.xlu1 %v2711_v28, %s2851_s3 }
 0xcfe   :  { %v773_v30 = vpop.permute.xlu1 %772 }
 0xcff   :  { %v775_v33 = vmul.f32 %v773_v30, %v770_v29 }
 0xd01   :  { %v778_v34 = vadd.f32 %v777_v31, %v775_v33 }
 0xd03   :  { %780 = vrot.lane.b32.xlu0 %v778_v34, %s2851_s3  ;;  %v885_v51 = vrot.slane %v778_v34, 6 }
 0xd75   :  { %v781_v35 = vpop.permute.xlu0 %780 }
 0xd76   :  { %783 = vst.msk [vmem:[#allocation2 + $0x8] sm:$0x3] %vm335_vm9, %v781_v35  ;;  %2504 = vmatmul.mubr.msk.f32.vlgmr.msra.gmra.mxu0 %vm227_vm10, %v781_v35 }
 0xd77   :  { %2518 = vmatpush3.msra.mxu0 %v2935_v7  ;;  %2525 = vmatprep.mubr.msk.f32.mxu0 %vm2849_vm0, %v2848_v0 }
 0xd78   :  { %2519 = vmatprep.subr.mxu0 %v2848_v0 }
 0xd79   :  { %2520 = vmatpush3.msra.mxu0 %v2941_v14 }
 0xd7a   :  { %2521 = vmatprep.subr.mxu0 %v2848_v0 }
 0xd7b   :  { %2522 = vmatpush3.msra.mxu0 %v2958_v27 }
 0xd7c   :  { %2523 = vmatprep.subr.mxu0 %v2848_v0 }
 0xd7d   :  { %2524 = vmatpush3.msra.mxu0 %v2969_v32 }
 0xd7e   :  { %2539 = vmatprep.subr.mxu0 %v2848_v0 }
 0xe36   :  { %v852_v36 = vpop.f32.mrf.mxu0 }
 0xe37   :  { %v866_v7 = vadd.f32 %v852_v36, %v3003_v42  ;;  %v857_v39 = vrot.slane %v852_v36, 6 }
 0xe38   :  { %v2505_v37 = vpop.f32.mrf.mxu0 }
 0xe39   :  { %v868_v38 = vrot.slane %v866_v7, 6  ;;  %v859_v14 = vadd.f32 %v857_v39, %v3001_v40  ;;  %v3167_v39 = vld [vmem:[%s3451_s6 + $0x8] sm:$0xff] }
 0xe3b   :  { %869 = vrot.lane.b32.xlu1 %v868_v38, %s2850_s24  ;;  %v2294_v41 = vmul.f32 -1.442695, %v859_v14  ;;  %v3154_v38 = vld [vmem:[%s3451_s6 + $0x18] sm:$0xff]  ;;  %v3174_v14 = vld [vmem:[%s3451_s6] sm:$0xff] }
 0xe3d   :  { %2712 = vpow2.f32 %v2294_v41  ;;  %v1124_v41 = vld [vmem:[%s3450_s5 + $0x10] sm:$0xff] }
 0xe4a   :  { %v2713_v43 = vpop.eup %2712 }
 0xe4b   :  { %v863_v27 = vadd.f32 1.0, %v2713_v43  ;;  %v1123_v43 = vld [vmem:[%s3450_s5 + $0x8] sm:$0xff] }
 0xe4d   :  { %2714 = vrcp.f32 %v863_v27  ;;  %v2302_v27 = vld [vmem:[%s3453_s8] ss:$0 sm:$0xff] }
 0xe5a   :  { %v2715_v44 = vpop.eup %2714 }
 0xe5b   :  { %v879_v52 = vsub.f32 1.0, %v2715_v44  ;;  %v887_v54 = vmul.f32 %v2715_v44, %v885_v51 }
 0xead   :  { %v870_v45 = vpop.permute.xlu1 %869 }
 0xeae   :  { %v872_v32 = vmul.f32 %v2715_v44, %v870_v45  ;;  %v1122_v44 = vld [vmem:[%s3450_s5] sm:$0xff] }
 0xeb0   :  { %874 = vrot.lane.b32.xlu0 %v872_v32, %s2850_s24 }
 0xf22   :  { %v875_v47 = vpop.permute.xlu0 %874 }
 0xf23   :  { %v877_v48 = vadd.f32 %v875_v47, %v3001_v40 }
 0xf25   :  { %2716 = vtanh.f32 %v877_v48 }
 0xf32   :  { %v2717_v49 = vpop.eup %2716 }
 0xf33   :  { %881 = vrot.lane.b32.xlu1 %v2717_v49, %s2851_s3 }
 0xfa5   :  { %v882_v53 = vpop.permute.xlu1 %881 }
 0xfa6   :  { %v884_v55 = vmul.f32 %v882_v53, %v879_v52 }
 0xfa8   :  { %v3115_v56 = vadd.f32 %v887_v54, %v884_v55 }
 0xfaa   :  { %v894_v57 = vrot.slane %v3115_v56, 2  ;;  %v998_v46 = vrot.slane %v3115_v56, 6 }
 0xfac   :  { %895 = vrot.lane.b32.xlu0 %v894_v57, %s2851_s3 }
0x101e   :  { %v896_v58 = vpop.permute.xlu0 %895 }
0x101f   :  { %2515 = vmatmul.mubr.msk.f32.vlgmr.msra.gmra.mxu1 %vm227_vm10, %v896_v58 }
0x10df   :  { %v965_v59 = vpop.f32.mrf.mxu1 }
0x10e0   :  { %v979_v60 = vadd.f32 %v965_v59, %v3003_v42  ;;  %v970_v63 = vrot.slane %v965_v59, 4 }
0x10e1   :  { %v2516_v61 = vpop.f32.mrf.mxu1 }
0x10e2   :  { %v981_v62 = vrot.slane %v979_v60, 4  ;;  %v972_v1 = vadd.f32 %v970_v63, %v3001_v40  ;;  %v2299_v61 = vld [vmem:[%s3452_s7] ss:$0 sm:$0xff] }
0x10e4   :  { %982 = vrot.lane.b32.xlu1 %v981_v62, %s2850_s24  ;;  %v2296_v2 = vmul.f32 -1.442695, %v972_v1 }
0x10e6   :  { %2718 = vpow2.f32 %v2296_v2 }
0x10f3   :  { %v2719_v3 = vpop.eup %2718 }
0x10f4   :  { %v976_v4 = vadd.f32 1.0, %v2719_v3 }
0x10f6   :  { %2720 = vrcp.f32 %v976_v4 }
0x1103   :  { %v2721_v5 = vpop.eup %2720 }
0x1104   :  { %v992_v13 = vsub.f32 1.0, %v2721_v5  ;;  %v1000_v16 = vmul.f32 %v2721_v5, %v998_v46 }
0x1156   :  { %v983_v6 = vpop.permute.xlu1 %982 }
0x1157   :  { %v985_v8 = vmul.f32 %v2721_v5, %v983_v6 }
0x1159   :  { %987 = vrot.lane.b32.xlu0 %v985_v8, %s2850_s24 }
0x11cb   :  { %v988_v9 = vpop.permute.xlu0 %987 }
0x11cc   :  { %v990_v10 = vadd.f32 %v988_v9, %v3001_v40 }
0x11ce   :  { %2722 = vtanh.f32 %v990_v10 }
0x11db   :  { %v2723_v12 = vpop.eup %2722 }
0x11dc   :  { %994 = vrot.lane.b32.xlu1 %v2723_v12, %s2851_s3 }
0x124e   :  { %v995_v15 = vpop.permute.xlu1 %994 }
0x124f   :  { %v997_v17 = vmul.f32 %v995_v15, %v992_v13 }
0x1251   :  { %v3127_v18 = vadd.f32 %v1000_v16, %v997_v17 }
0x1253   :  { %v1007_v19 = vrot.slane %v3127_v18, 4  ;;  %v1111_v32 = vrot.slane %v3127_v18, 6 }
0x1255   :  { %1008 = vrot.lane.b32.xlu0 %v1007_v19, %s2851_s3 }
0x12c7   :  { %v1009_v20 = vpop.permute.xlu0 %1008 }
0x12c8   :  { %2526 = vmatmul.mubr.msk.f32.vlgmr.msra.gmra.mxu0 %vm227_vm10, %v1009_v20 }
0x12c9   :  { %2547 = vmatprep.mubr.msk.f32.mxu0 %vm2849_vm0, %v2848_v0  ;;  %2540 = vmatpush3.msra.mxu0 %v3154_v38 }
0x12ca   :  { %2541 = vmatprep.subr.mxu0 %v2848_v0 }
0x1388   :  { %v1078_v21 = vpop.f32.mrf.mxu0 }
0x1389   :  { %v1092_v23 = vadd.f32 %v1078_v21, %v3003_v42  ;;  %v1083_v26 = vrot.slane %v1078_v21, 2 }
0x138a   :  { %v2527_v24 = vpop.f32.mrf.mxu0 }
0x138b   :  { %v1094_v25 = vrot.slane %v1092_v23, 2  ;;  %v1085_v28 = vadd.f32 %v1083_v26, %v3001_v40 }
0x138d   :  { %1095 = vrot.lane.b32.xlu1 %v1094_v25, %s2850_s24  ;;  %v2298_v29 = vmul.f32 -1.442695, %v1085_v28 }
0x138f   :  { %2724 = vpow2.f32 %v2298_v29 }
0x139c   :  { %v2725_v30 = vpop.eup %2724 }
0x139d   :  { %v1089_v31 = vadd.f32 1.0, %v2725_v30 }
0x139f   :  { %2726 = vrcp.f32 %v1089_v31 }
0x13ac   :  { %v3137_v33 = vpop.eup %2726 }
0x13ad   :  { %v1105_v45 = vsub.f32 1.0, %v3137_v33  ;;  %v1113_v48 = vmul.f32 %v3137_v33, %v1111_v32 }
0x13ff   :  { %v1096_v34 = vpop.permute.xlu1 %1095 }
0x1400   :  { %v1098_v35 = vmul.f32 %v3137_v33, %v1096_v34 }
0x1402   :  { %1100 = vrot.lane.b32.xlu0 %v1098_v35, %s2850_s24 }
0x1406   :  { %443 = vrot.lane.b32.xlu0 %v3032_v22, %s2851_s3 }
0x140a   :  { %671 = vrot.lane.b32.xlu0 %v3076_v11, %s2851_s3 }
0x140e   :  { %1003 = vrot.lane.b32.xlu0 %v3127_v18, %s2851_s3 }
0x1412   :  { %1301 = vrot.lane.b32.xlu0 %v2302_v27, %s2850_s24 }
0x1474   :  { %v1101_v42 = vpop.permute.xlu0 %1100 }
0x1475   :  { %v1103_v36 = vadd.f32 %v1101_v42, %v3001_v40  ;;  %v3159_v40 = vld [vmem:[%s3451_s6 + $0x10] sm:$0xff] }
0x1476   :  { %2542 = vmatpush3.msra.mxu0 %v3159_v40 }
0x1477   :  { %2728 = vtanh.f32 %v1103_v36  ;;  %2543 = vmatprep.subr.mxu0 %v2848_v0 }
0x1478   :  { %v444_v7 = vpop.permute.xlu0 %443  ;;  %2544 = vmatpush3.msra.mxu0 %v3167_v39 }
0x1479   :  { %447 = vst.msk [vmem:[#allocation2] sm:$0xc] %vm446_vm11, %v444_v7  ;;  %2545 = vmatprep.subr.mxu0 %v2848_v0 }
0x147a   :  { %2546 = vmatpush3.msra.mxu0 %v3174_v14 }
0x147b   :  { %2548 = vmatmul.mubr.f32.vlgmr.msra.gmra.mxu0 %v2848_v0  ;;  %2561 = vmatprep.subr.mxu0 %v2848_v0 }
0x147c   :  { %v672_v37 = vpop.permute.xlu0 %671  ;;  %2562 = vmatpush3.msra.mxu0 %v3154_v38  ;;  %2569 = vmatprep.mubr.msk.f32.mxu0 %vm2849_vm0, %v2848_v0 }
0x147d   :  { %675 = vst.msk [vmem:[#allocation2] sm:$0xc0] %vm674_vm12, %v672_v37  ;;  %2563 = vmatprep.subr.mxu0 %v2848_v0 }
0x147e   :  { %2564 = vmatpush3.msra.mxu0 %v3159_v40 }
0x147f   :  { %2565 = vmatprep.subr.mxu0 %v2848_v0 }
0x1480   :  { %v1004_v22 = vpop.permute.xlu0 %1003  ;;  %2566 = vmatpush3.msra.mxu0 %v3167_v39 }
0x1481   :  { %1006 = vst.msk [vmem:[#allocation2 + $0x8] sm:$0x30] %vm560_vm13, %v1004_v22  ;;  %2567 = vmatprep.subr.mxu0 %v2848_v0 }
0x1482   :  { %2568 = vmatpush3.msra.mxu0 %v3174_v14 }
0x1483   :  { %2583 = vmatprep.subr.mxu0 %v2848_v0 }
0x1484   :  { %v2729_v11 = vpop.eup %2728  ;;  %v3219_v57 = vpop.permute.xlu0 %1301 }
0x1485   :  { %1107 = vrot.lane.b32.xlu1 %v2729_v11, %s2851_s3 }
0x1489   :  { %557 = vrot.lane.b32.xlu1 %v3054_v50, %s2851_s3  ;;  %v1125_v50 = vld [vmem:[%s3450_s5 + $0x18] sm:$0xff] }
0x148a   :  { %2528 = vmatprep.subr.mxu1 %v1125_v50 }
0x148b   :  { %2529 = vmatpush3.msra.mxu1 %v1125_v50 }
0x148c   :  { %2530 = vmatprep.subr.mxu1 %v1124_v41 }
0x148d   :  { %890 = vrot.lane.b32.xlu1 %v3115_v56, %s2851_s3  ;;  %2531 = vmatpush3.msra.mxu1 %v1124_v41 }
0x148e   :  { %2532 = vmatprep.subr.mxu1 %v1123_v43 }
0x148f   :  { %2533 = vmatpush3.msra.mxu1 %v1123_v43 }
0x1490   :  { %2534 = vmatprep.subr.mxu1 %v1122_v44 }
0x1491   :  { %2535 = vmatpush3.msra.mxu1 %v1122_v44 }
0x1492   :  { %2550 = vmatprep.subr.mxu1 %v2848_v0 }
0x14f7   :  { %v1108_v47 = vpop.permute.xlu1 %1107 }
0x14f8   :  { %v1110_v49 = vmul.f32 %v1108_v47, %v1105_v45 }
0x14fa   :  { %v1114_v51 = vadd.f32 %v1113_v48, %v1110_v49 }
0x14fb   :  { %v558_v52 = vpop.permute.xlu1 %557 }
0x14fc   :  { %561 = vst.msk [vmem:[#allocation2] sm:$0x30] %vm560_vm13, %v558_v52  ;;  %1116 = vrot.lane.b32.xlu1 %v1114_v51, %s2851_s3 }
0x14ff   :  { %v891_v53 = vpop.permute.xlu1 %890 }
0x1500   :  { %893 = vst.msk [vmem:[#allocation2 + $0x8] sm:$0xc] %vm446_vm11, %v891_v53 }
0x1503   :  { %v1120_v54 = vld [vmem:[#allocation2] sm:$0xff] }
0x1504   :  { %2536 = vmatprep.mubr.msk.f32.mxu1 %vm227_vm10, %v1120_v54 }
0x153b   :  { %v1290_v55 = vpop.f32.mrf.mxu0 }
0x153c   :  { %v1304_v58 = vadd.f32 %v3219_v57, %v1290_v55 }
0x153d   :  { %v2549_v56 = vpop.f32.mrf.mxu0 }
0x153e   :  { %1306 = vrot.lane.b32.xlu1 %v1304_v58, %s2850_s24 }
0x156e   :  { %v1117_v59 = vpop.permute.xlu1 %1116 }
0x156f   :  { %1119 = vst.msk [vmem:[#allocation2 + $0x8] sm:$0xc0] %vm674_vm12, %v1117_v59 }
0x1576   :  { %v1121_v60 = vld [vmem:[#allocation2 + $0x8] sm:$0xff] }
0x1577   :  { %2537 = vmatmul.mubr.msk.f32.vlgmr.msra.gmra.mxu1 %vm227_vm10, %v1121_v60 }
0x1578   :  { %2551 = vmatpush3.msra.mxu1 %v3154_v38  ;;  %2558 = vmatprep.mubr.msk.f32.mxu1 %vm2849_vm0, %v2848_v0 }
0x1579   :  { %2552 = vmatprep.subr.mxu1 %v2848_v0 }
0x157a   :  { %2553 = vmatpush3.msra.mxu1 %v3159_v40 }
0x157b   :  { %2554 = vmatprep.subr.mxu1 %v2848_v0 }
0x157c   :  { %2555 = vmatpush3.msra.mxu1 %v3167_v39 }
0x157d   :  { %2556 = vmatprep.subr.mxu1 %v2848_v0 }
0x157e   :  { %2557 = vmatpush3.msra.mxu1 %v3174_v14 }
0x157f   :  { %2572 = vmatprep.subr.mxu1 %v2848_v0 }
0x15b0   :  { %v1307_v8 = vpop.permute.xlu1 %1306 }
0x1637   :  { %v2538_v62 = vpop.f32.mrf.mxu1 }
0x1638   :  { %v3238_v63 = vadd.f32 %v2538_v62, %v2299_v61 }
0x1639   :  { %v1205_v1 = vpop.f32.mrf.mxu1 }
0x163a   :  { %v3240_v2 = vadd.f32 %v2299_v61, %v1205_v1 }
0x163c   :  { %v1294_v3 = vadd.f32 %v1290_v55, %v3240_v2 }
0x163e   :  { %v2303_v4 = vmul.f32 -1.442695, %v1294_v3 }
0x1640   :  { %2730 = vpow2.f32 %v2303_v4 }
0x164d   :  { %v2731_v5 = vpop.eup %2730 }
0x164e   :  { %v1298_v6 = vadd.f32 1.0, %v2731_v5 }
0x1650   :  { %2732 = vrcp.f32 %v1298_v6 }
0x165d   :  { %v2733_v9 = vpop.eup %2732 }
0x165e   :  { %v1309_v10 = vmul.f32 %v2733_v9, %v1307_v8  ;;  %v1316_v15 = vsub.f32 1.0, %v2733_v9  ;;  %v1322_v17 = vmul.f32 0.0, %v2733_v9 }
0x1660   :  { %1311 = vrot.lane.b32.xlu0 %v1309_v10, %s2850_s24 }
0x16d2   :  { %v1312_v12 = vpop.permute.xlu0 %1311 }
0x16d3   :  { %v1314_v13 = vadd.f32 %v1312_v12, %v3240_v2 }
0x16d5   :  { %2734 = vtanh.f32 %v1314_v13 }
0x16e2   :  { %v2735_v46 = vpop.eup %2734 }
0x16e3   :  { %1318 = vrot.lane.b32.xlu1 %v2735_v46, %s2851_s3 }
0x1755   :  { %v1319_v16 = vpop.permute.xlu1 %1318 }
0x1756   :  { %v1321_v18 = vmul.f32 %v1319_v16, %v1316_v15 }
0x1758   :  { %v1323_v19 = vadd.f32 %v1322_v17, %v1321_v18 }
0x175a   :  { %1325 = vrot.lane.b32.xlu0 %v1323_v19, %s2851_s3  ;;  %v1428_v37 = vrot.slane %v1323_v19, 6 }
0x17cc   :  { %v1326_v20 = vpop.permute.xlu0 %1325 }
0x17cd   :  { %2559 = vmatmul.mubr.msk.f32.vlgmr.msra.gmra.mxu1 %vm227_vm10, %v1326_v20 }
0x17ce   :  { %2573 = vmatpush3.msra.mxu1 %v3154_v38  ;;  %2580 = vmatprep.mubr.msk.f32.mxu1 %vm2849_vm0, %v2848_v0 }
0x17cf   :  { %2574 = vmatprep.subr.mxu1 %v2848_v0 }
0x17d0   :  { %2575 = vmatpush3.msra.mxu1 %v3159_v40 }
0x17d1   :  { %2576 = vmatprep.subr.mxu1 %v2848_v0 }
0x17d2   :  { %2577 = vmatpush3.msra.mxu1 %v3167_v39 }
0x17d3   :  { %2578 = vmatprep.subr.mxu1 %v2848_v0 }
0x17d4   :  { %2579 = vmatpush3.msra.mxu1 %v3174_v14 }
0x17d5   :  { %2594 = vmatprep.subr.mxu1 %v2848_v0 }
0x188d   :  { %v1395_v21 = vpop.f32.mrf.mxu1 }
0x188e   :  { %v1409_v23 = vadd.f32 %v1395_v21, %v3219_v57  ;;  %v1400_v26 = vrot.slane %v1395_v21, 6 }
0x188f   :  { %v2560_v24 = vpop.f32.mrf.mxu1 }
0x1890   :  { %v1411_v25 = vrot.slane %v1409_v23, 6  ;;  %v1402_v28 = vadd.f32 %v1400_v26, %v3240_v2 }
0x1892   :  { %1412 = vrot.lane.b32.xlu1 %v1411_v25, %s2850_s24  ;;  %v2305_v29 = vmul.f32 -1.442695, %v1402_v28 }
0x1894   :  { %2736 = vpow2.f32 %v2305_v29 }
0x18a1   :  { %v2737_v30 = vpop.eup %2736 }
0x18a2   :  { %v1406_v31 = vadd.f32 1.0, %v2737_v30 }
0x18a4   :  { %2738 = vrcp.f32 %v1406_v31 }
0x18b1   :  { %v2739_v33 = vpop.eup %2738 }
0x18b2   :  { %v1422_v22 = vsub.f32 1.0, %v2739_v33  ;;  %v1430_v41 = vmul.f32 %v2739_v33, %v1428_v37 }
0x1904   :  { %v1413_v34 = vpop.permute.xlu1 %1412 }
0x1905   :  { %v1415_v35 = vmul.f32 %v2739_v33, %v1413_v34 }
0x1907   :  { %1417 = vrot.lane.b32.xlu0 %v1415_v35, %s2850_s24 }
0x1979   :  { %v1418_v42 = vpop.permute.xlu0 %1417 }
0x197a   :  { %v1420_v36 = vadd.f32 %v1418_v42, %v3240_v2 }
0x197c   :  { %2740 = vtanh.f32 %v1420_v36 }
0x1989   :  { %v2741_v7 = vpop.eup %2740 }
0x198a   :  { %1424 = vrot.lane.b32.xlu1 %v2741_v7, %s2851_s3 }
0x19fc   :  { %v1425_v11 = vpop.permute.xlu1 %1424 }
0x19fd   :  { %v1427_v50 = vmul.f32 %v1425_v11, %v1422_v22 }
0x19ff   :  { %v1431_v43 = vadd.f32 %v1430_v41, %v1427_v50 }
0x1a01   :  { %v1433_v27 = vrot.slane %v1431_v43, 2  ;;  %v1537_v62 = vrot.slane %v1431_v43, 6 }
0x1a03   :  { %1434 = vrot.lane.b32.xlu0 %v1433_v27, %s2851_s3 }
0x1a75   :  { %v1435_v44 = vpop.permute.xlu0 %1434 }
0x1a76   :  { %2570 = vmatmul.mubr.msk.f32.vlgmr.msra.gmra.mxu0 %vm227_vm10, %v1435_v44 }
0x1a77   :  { %2584 = vmatpush3.msra.mxu0 %v3154_v38  ;;  %2591 = vmatprep.mubr.msk.f32.mxu0 %vm2849_vm0, %v2848_v0 }
0x1a78   :  { %2585 = vmatprep.subr.mxu0 %v2848_v0 }
0x1a79   :  { %2586 = vmatpush3.msra.mxu0 %v3159_v40 }
0x1a7a   :  { %2587 = vmatprep.subr.mxu0 %v2848_v0 }
0x1a7b   :  { %2588 = vmatpush3.msra.mxu0 %v3167_v39 }
0x1a7c   :  { %2589 = vmatprep.subr.mxu0 %v2848_v0 }
0x1a7d   :  { %2590 = vmatpush3.msra.mxu0 %v3174_v14 }
0x1a7e   :  { %2605 = vmatprep.subr.mxu0 %v2848_v0 }
0x1b36   :  { %v1504_v45 = vpop.f32.mrf.mxu0 }
0x1b37   :  { %v1518_v32 = vadd.f32 %v1504_v45, %v3219_v57  ;;  %v1509_v49 = vrot.slane %v1504_v45, 4 }
0x1b38   :  { %v2571_v47 = vpop.f32.mrf.mxu0 }
0x1b39   :  { %v1520_v48 = vrot.slane %v1518_v32, 4  ;;  %v1511_v51 = vadd.f32 %v1509_v49, %v3240_v2 }
0x1b3b   :  { %1521 = vrot.lane.b32.xlu1 %v1520_v48, %s2850_s24  ;;  %v2307_v52 = vmul.f32 -1.442695, %v1511_v51 }
0x1b3d   :  { %2742 = vpow2.f32 %v2307_v52 }
0x1b4a   :  { %v2743_v53 = vpop.eup %2742 }
0x1b4b   :  { %v1515_v54 = vadd.f32 1.0, %v2743_v53 }
0x1b4d   :  { %2744 = vrcp.f32 %v1515_v54 }
0x1b5a   :  { %v2745_v55 = vpop.eup %2744 }
0x1b5b   :  { %v1531_v1 = vsub.f32 1.0, %v2745_v55  ;;  %v1539_v4 = vmul.f32 %v2745_v55, %v1537_v62 }
0x1bad   :  { %v1522_v56 = vpop.permute.xlu1 %1521 }
0x1bae   :  { %v1524_v58 = vmul.f32 %v2745_v55, %v1522_v56 }
0x1bb0   :  { %1526 = vrot.lane.b32.xlu0 %v1524_v58, %s2850_s24 }
0x1c22   :  { %v1527_v59 = vpop.permute.xlu0 %1526 }
0x1c23   :  { %v1529_v60 = vadd.f32 %v1527_v59, %v3240_v2 }
0x1c25   :  { %2746 = vtanh.f32 %v1529_v60 }
0x1c32   :  { %v2747_v61 = vpop.eup %2746 }
0x1c33   :  { %1533 = vrot.lane.b32.xlu1 %v2747_v61, %s2851_s3 }
0x1ca5   :  { %v1534_v3 = vpop.permute.xlu1 %1533 }
0x1ca6   :  { %v1536_v5 = vmul.f32 %v1534_v3, %v1531_v1 }
0x1ca8   :  { %v1540_v6 = vadd.f32 %v1539_v4, %v1536_v5 }
0x1caa   :  { %v1542_v8 = vrot.slane %v1540_v6, 4  ;;  %v1646_v28 = vrot.slane %v1540_v6, 6 }
0x1cac   :  { %1543 = vrot.lane.b32.xlu0 %v1542_v8, %s2851_s3 }
0x1d1e   :  { %v1544_v9 = vpop.permute.xlu0 %1543 }
0x1d1f   :  { %2581 = vmatmul.mubr.msk.f32.vlgmr.msra.gmra.mxu1 %vm227_vm10, %v1544_v9 }
0x1d20   :  { %2595 = vmatpush3.msra.mxu1 %v3154_v38  ;;  %2602 = vmatprep.mubr.msk.f32.mxu1 %vm2849_vm0, %v2848_v0 }
0x1d21   :  { %2596 = vmatprep.subr.mxu1 %v2848_v0 }
0x1d22   :  { %2597 = vmatpush3.msra.mxu1 %v3159_v40 }
0x1d23   :  { %2598 = vmatprep.subr.mxu1 %v2848_v0 }
0x1d24   :  { %2599 = vmatpush3.msra.mxu1 %v3167_v39 }
0x1d25   :  { %2600 = vmatprep.subr.mxu1 %v2848_v0 }
0x1d26   :  { %2601 = vmatpush3.msra.mxu1 %v3174_v14 }
0x1d27   :  { %2616 = vmatprep.subr.mxu1 %v2848_v0 }
0x1ddf   :  { %v1613_v10 = vpop.f32.mrf.mxu1 }
0x1de0   :  { %v1627_v12 = vadd.f32 %v1613_v10, %v3219_v57  ;;  %v1618_v15 = vrot.slane %v1613_v10, 2 }
0x1de1   :  { %v2582_v13 = vpop.f32.mrf.mxu1 }
0x1de2   :  { %v1629_v46 = vrot.slane %v1627_v12, 2  ;;  %v1620_v16 = vadd.f32 %v1618_v15, %v3240_v2 }
0x1de4   :  { %1630 = vrot.lane.b32.xlu1 %v1629_v46, %s2850_s24  ;;  %v2309_v17 = vmul.f32 -1.442695, %v1620_v16 }
0x1de6   :  { %2748 = vpow2.f32 %v2309_v17 }
0x1df3   :  { %v2749_v18 = vpop.eup %2748 }
0x1df4   :  { %v1624_v19 = vadd.f32 1.0, %v2749_v18 }
0x1df6   :  { %2750 = vrcp.f32 %v1624_v19 }
0x1e03   :  { %v2751_v20 = vpop.eup %2750 }
0x1e04   :  { %v1640_v29 = vsub.f32 1.0, %v2751_v20  ;;  %v1648_v31 = vmul.f32 %v2751_v20, %v1646_v28 }
0x1e56   :  { %v1631_v21 = vpop.permute.xlu1 %1630 }
0x1e57   :  { %v1633_v23 = vmul.f32 %v2751_v20, %v1631_v21 }
0x1e59   :  { %1635 = vrot.lane.b32.xlu0 %v1633_v23, %s2850_s24 }
0x1ecb   :  { %v1636_v24 = vpop.permute.xlu0 %1635 }
0x1ecc   :  { %v1638_v25 = vadd.f32 %v1636_v24, %v3240_v2 }
0x1ece   :  { %2752 = vtanh.f32 %v1638_v25 }
0x1edb   :  { %v2753_v26 = vpop.eup %2752 }
0x1edc   :  { %1642 = vrot.lane.b32.xlu1 %v2753_v26, %s2851_s3 }
0x1f4e   :  { %v1643_v30 = vpop.permute.xlu1 %1642 }
0x1f4f   :  { %v1645_v33 = vmul.f32 %v1643_v30, %v1640_v29 }
0x1f51   :  { %v1649_v34 = vadd.f32 %v1648_v31, %v1645_v33 }
0x1f53   :  { %v1651_v35 = vrot.slane %v1649_v34, 6 }
0x1f55   :  { %1652 = vrot.lane.b32.xlu0 %v1651_v35, %s2851_s3 }
0x1fc7   :  { %v1653_v42 = vpop.permute.xlu0 %1652 }
0x1fc8   :  { %2592 = vmatmul.mubr.msk.f32.vlgmr.msra.gmra.mxu0 %vm227_vm10, %v1653_v42 }
0x1fc9   :  { %2606 = vmatpush3.msra.mxu0 %v3154_v38  ;;  %2613 = vmatprep.mubr.msk.f32.mxu0 %vm2849_vm0, %v2848_v0 }
0x1fca   :  { %2607 = vmatprep.subr.mxu0 %v2848_v0 }
0x1fcb   :  { %2608 = vmatpush3.msra.mxu0 %v3159_v40 }
0x1fcc   :  { %2609 = vmatprep.subr.mxu0 %v2848_v0 }
0x1fcd   :  { %2610 = vmatpush3.msra.mxu0 %v3167_v39 }
0x1fce   :  { %2611 = vmatprep.subr.mxu0 %v2848_v0 }
0x1fcf   :  { %2612 = vmatpush3.msra.mxu0 %v3174_v14 }
0x1fd0   :  { %2627 = vmatprep.subr.mxu0 %v2848_v0 }
0x2088   :  { %v1722_v2 = vpop.f32.mrf.mxu0 }
0x2089   :  { %v1733_v36 = vadd.f32 %v1722_v2, %v3219_v57  ;;  %v1726_v37 = vadd.f32 %v1722_v2, %v3238_v63 }
0x208a   :  { %v2593_v7 = vpop.f32.mrf.mxu0 }
0x208b   :  { %1735 = vrot.lane.b32.xlu1 %v1733_v36, %s2850_s24  ;;  %v2311_v22 = vmul.f32 -1.442695, %v1726_v37 }
0x208d   :  { %2754 = vpow2.f32 %v2311_v22 }
0x209a   :  { %v2755_v11 = vpop.eup %2754 }
0x209b   :  { %v1730_v50 = vadd.f32 1.0, %v2755_v11 }
0x209d   :  { %2756 = vrcp.f32 %v1730_v50 }
0x20aa   :  { %v2757_v41 = vpop.eup %2756 }
0x20ab   :  { %v1745_v47 = vsub.f32 1.0, %v2757_v41  ;;  %v1752_v49 = vmul.f32 %v2757_v41, %v1651_v35 }
0x20fd   :  { %v1736_v43 = vpop.permute.xlu1 %1735 }
0x20fe   :  { %v1738_v27 = vmul.f32 %v2757_v41, %v1736_v43 }
0x2100   :  { %1740 = vrot.lane.b32.xlu0 %v1738_v27, %s2850_s24 }
0x2172   :  { %v1741_v44 = vpop.permute.xlu0 %1740 }
0x2173   :  { %v1743_v45 = vadd.f32 %v1741_v44, %v3238_v63 }
0x2175   :  { %2758 = vtanh.f32 %v1743_v45 }
0x2182   :  { %v2759_v32 = vpop.eup %2758 }
0x2183   :  { %1747 = vrot.lane.b32.xlu1 %v2759_v32, %s2851_s3 }
0x21f5   :  { %v1748_v48 = vpop.permute.xlu1 %1747 }
0x21f6   :  { %v1750_v51 = vmul.f32 %v1748_v48, %v1745_v47 }
0x21f8   :  { %v1753_v52 = vadd.f32 %v1752_v49, %v1750_v51 }
0x21fa   :  { %1755 = vrot.lane.b32.xlu0 %v1753_v52, %s2851_s3  ;;  %v1858_v5 = vrot.slane %v1753_v52, 6  ;;  %v2084_v52 = vld [vmem:[%s3454_s9 + $0x18] sm:$0xff] }
0x226c   :  { %v1756_v53 = vpop.permute.xlu0 %1755 }
0x226d   :  { %2603 = vmatmul.mubr.msk.f32.vlgmr.msra.gmra.mxu1 %vm227_vm10, %v1756_v53  ;;  %v2083_v53 = vld [vmem:[%s3454_s9 + $0x10] sm:$0xff] }
0x226e   :  { %2617 = vmatpush3.msra.mxu1 %v3154_v38  ;;  %2624 = vmatprep.mubr.msk.f32.mxu1 %vm2849_vm0, %v2848_v0 }
0x226f   :  { %2618 = vmatprep.subr.mxu1 %v2848_v0 }
0x2270   :  { %2619 = vmatpush3.msra.mxu1 %v3159_v40 }
0x2271   :  { %2620 = vmatprep.subr.mxu1 %v2848_v0 }
0x2272   :  { %2621 = vmatpush3.msra.mxu1 %v3167_v39 }
0x2273   :  { %2622 = vmatprep.subr.mxu1 %v2848_v0 }
0x2274   :  { %2623 = vmatpush3.msra.mxu1 %v3174_v14 }
0x2275   :  { %2638 = vmatprep.subr.mxu1 %v2848_v0 }
0x232d   :  { %v1825_v54 = vpop.f32.mrf.mxu1 }
0x232e   :  { %v1839_v38 = vadd.f32 %v1825_v54, %v3219_v57  ;;  %v1830_v58 = vrot.slane %v1825_v54, 6  ;;  %v2082_v54 = vld [vmem:[%s3454_s9 + $0x8] sm:$0xff] }
0x232f   :  { %v2604_v55 = vpop.f32.mrf.mxu1 }
0x2330   :  { %v1841_v56 = vrot.slane %v1839_v38, 6  ;;  %v1832_v40 = vadd.f32 %v1830_v58, %v3238_v63  ;;  %v2184_v55 = vld [vmem:[%s3456_s11 + $0x78] sm:$0xff]  ;;  %v2182_v58 = vld [vmem:[%s3456_s11 + $0x68] sm:$0xff] }
0x2332   :  { %1842 = vrot.lane.b32.xlu1 %v1841_v56, %s2850_s24  ;;  %v2313_v59 = vmul.f32 -1.442695, %v1832_v40  ;;  %v2183_v56 = vld [vmem:[%s3456_s11 + $0x70] sm:$0xff] }
0x2334   :  { %2760 = vpow2.f32 %v2313_v59 }
0x2341   :  { %v2761_v60 = vpop.eup %2760 }
0x2342   :  { %v1836_v39 = vadd.f32 1.0, %v2761_v60 }
0x2344   :  { %2762 = vrcp.f32 %v1836_v39  ;;  %v2181_v39 = vld [vmem:[%s3456_s11 + $0x60] sm:$0xff] }
0x2351   :  { %v2763_v61 = vpop.eup %2762 }
0x2352   :  { %v1852_v6 = vsub.f32 1.0, %v2763_v61  ;;  %v1860_v10 = vmul.f32 %v2763_v61, %v1858_v5  ;;  %v2178_v5 = vld [vmem:[%s3456_s11 + $0x48] sm:$0xff] }
0x23a4   :  { %v1843_v62 = vpop.permute.xlu1 %1842 }
0x23a5   :  { %v1845_v14 = vmul.f32 %v2763_v61, %v1843_v62 }
0x23a7   :  { %1847 = vrot.lane.b32.xlu0 %v1845_v14, %s2850_s24  ;;  %v2180_v14 = vld [vmem:[%s3456_s11 + $0x58] sm:$0xff] }
0x2419   :  { %v1848_v1 = vpop.permute.xlu0 %1847 }
0x241a   :  { %v1850_v3 = vadd.f32 %v1848_v1, %v3238_v63 }
0x241c   :  { %2764 = vtanh.f32 %v1850_v3  ;;  %v2179_v3 = vld [vmem:[%s3456_s11 + $0x50] sm:$0xff] }
0x2429   :  { %v2765_v4 = vpop.eup %2764 }
0x242a   :  { %1854 = vrot.lane.b32.xlu1 %v2765_v4, %s2851_s3 }
0x249c   :  { %v1855_v8 = vpop.permute.xlu1 %1854 }
0x249d   :  { %v1857_v9 = vmul.f32 %v1855_v8, %v1852_v6  ;;  %v2177_v8 = vld [vmem:[%s3456_s11 + $0x40] sm:$0xff] }
0x249f   :  { %v1861_v12 = vadd.f32 %v1860_v10, %v1857_v9  ;;  %v2176_v9 = vld [vmem:[%s3456_s11 + $0x38] sm:$0xff]  ;;  %v2175_v10 = vld [vmem:[%s3456_s11 + $0x30] sm:$0xff] }
0x24a1   :  { %v1863_v13 = vrot.slane %v1861_v12, 2  ;;  %v1967_v33 = vrot.slane %v1861_v12, 6  ;;  %v2174_v12 = vld [vmem:[%s3456_s11 + $0x28] sm:$0xff] }
0x24a3   :  { %1864 = vrot.lane.b32.xlu0 %v1863_v13, %s2851_s3  ;;  %v2173_v13 = vld [vmem:[%s3456_s11 + $0x20] sm:$0xff] }
0x2515   :  { %v1865_v46 = vpop.permute.xlu0 %1864 }
0x2516   :  { %2614 = vmatmul.mubr.msk.f32.vlgmr.msra.gmra.mxu0 %vm227_vm10, %v1865_v46  ;;  %v2172_v46 = vld [vmem:[%s3456_s11 + $0x18] sm:$0xff] }
0x2517   :  { %2635 = vmatprep.mubr.msk.f32.mxu0 %vm2849_vm0, %v2848_v0  ;;  %2628 = vmatpush3.msra.mxu0 %v2084_v52 }
0x2518   :  { %2629 = vmatprep.subr.mxu0 %v2848_v0 }
0x2519   :  { %2630 = vmatpush3.msra.mxu0 %v2083_v53 }
0x251a   :  { %2631 = vmatprep.subr.mxu0 %v2848_v0 }
0x251b   :  { %2632 = vmatpush3.msra.mxu0 %v2082_v54 }
0x251c   :  { %2633 = vmatprep.subr.mxu0 %v2848_v0 }
0x25d6   :  { %v1934_v15 = vpop.f32.mrf.mxu0 }
0x25d7   :  { %v1948_v16 = vadd.f32 %v1934_v15, %v3219_v57  ;;  %v1939_v19 = vrot.slane %v1934_v15, 4 }
0x25d8   :  { %v2615_v17 = vpop.f32.mrf.mxu0 }
0x25d9   :  { %v1950_v18 = vrot.slane %v1948_v16, 4  ;;  %v1941_v20 = vadd.f32 %v1939_v19, %v3238_v63  ;;  %v2171_v16 = vld [vmem:[%s3456_s11 + $0x10] sm:$0xff]  ;;  %v2170_v17 = vld [vmem:[%s3456_s11 + $0x8] sm:$0xff]  ;;  %v2318_v19 = vld [vmem:[%s3455_s10] ss:$0 sm:$0xff] }
0x25db   :  { %1951 = vrot.lane.b32.xlu1 %v1950_v18, %s2850_s24  ;;  %v2315_v21 = vmul.f32 -1.442695, %v1941_v20  ;;  %v2169_v18 = vld [vmem:[%s3456_s11] sm:$0xff]  ;;  %s2818_s11 = scalar_lea.vmem %s2271_s21, 32 }
0x25dc   :  { %p2819_p10 = scmp.ne.s32.totalorder %s2271_s21, %s2818_s11  ;;  %p2824_p12 = scmp.lt.s32.totalorder %s2818_s11, %s2818_s11 }
0x25dd   :  { %2766 = vpow2.f32 %v2315_v21 }
0x25de   :  { %p2825_p13 = por %p2824_p12, %p2823_p11 }
0x25e0   :  { %p2826_p0 = pnand %p2825_p13, %p2819_p10 }
0x25ea   :  { %v2767_v23 = vpop.eup %2766 }
0x25eb   :  { %v1945_v24 = vadd.f32 1.0, %v2767_v23 }
0x25ed   :  { %2768 = vrcp.f32 %v1945_v24 }
0x25fa   :  { %v2769_v25 = vpop.eup %2768 }
0x25fb   :  { %v1961_v34 = vsub.f32 1.0, %v2769_v25  ;;  %v1969_v42 = vmul.f32 %v2769_v25, %v1967_v33 }
0x264d   :  { %v1952_v26 = vpop.permute.xlu1 %1951 }
0x264e   :  { %v1954_v28 = vmul.f32 %v2769_v25, %v1952_v26  ;;  %v2320_v25 = vld [vmem:[%s3457_s12] ss:$0 sm:$0xff] }
0x2650   :  { %1956 = vrot.lane.b32.xlu0 %v1954_v28, %s2850_s24 }
0x26c2   :  { %v1957_v29 = vpop.permute.xlu0 %1956 }
0x26c3   :  { %v1959_v30 = vadd.f32 %v1957_v29, %v3238_v63 }
0x26c5   :  { %2770 = vtanh.f32 %v1959_v30 }
0x26d2   :  { %v2771_v31 = vpop.eup %2770 }
0x26d3   :  { %1963 = vrot.lane.b32.xlu1 %v2771_v31, %s2851_s3 }
0x2745   :  { %v1964_v35 = vpop.permute.xlu1 %1963 }
0x2746   :  { %v1966_v2 = vmul.f32 %v1964_v35, %v1961_v34 }
0x2748   :  { %v1970_v36 = vadd.f32 %v1969_v42, %v1966_v2 }
0x274a   :  { %v1972_v7 = vrot.slane %v1970_v36, 4  ;;  %v2076_v40 = vrot.slane %v1970_v36, 6 }
0x274c   :  { %1973 = vrot.lane.b32.xlu0 %v1972_v7, %s2851_s3 }
0x27be   :  { %v1974_v37 = vpop.permute.xlu0 %1973 }
0x27bf   :  { %2625 = vmatmul.mubr.msk.f32.vlgmr.msra.gmra.mxu1 %vm227_vm10, %v1974_v37 }
0x27c0   :  { %2670 = vmatprep.mubr.msk.f32.mxu1 %vm2849_vm0, %v2848_v0  ;;  %2639 = vmatpush3.msra.mxu1 %v2184_v55 }
0x27c1   :  { %2640 = vmatprep.subr.mxu1 %v2848_v0 }
0x27c2   :  { %2641 = vmatpush3.msra.mxu1 %v2183_v56 }
0x27c3   :  { %2642 = vmatprep.subr.mxu1 %v2848_v0 }
0x27c4   :  { %2643 = vmatpush3.msra.mxu1 %v2182_v58 }
0x27c5   :  { %2644 = vmatprep.subr.mxu1 %v2848_v0 }
0x27c6   :  { %2645 = vmatpush3.msra.mxu1 %v2181_v39 }
0x27c7   :  { %2646 = vmatprep.subr.mxu1 %v2848_v0 }
0x27c8   :  { %2647 = vmatpush3.msra.mxu1 %v2180_v14 }
0x27c9   :  { %2648 = vmatprep.subr.mxu1 %v2848_v0 }
0x27ca   :  { %2649 = vmatpush3.msra.mxu1 %v2179_v3 }
0x27cb   :  { %2650 = vmatprep.subr.mxu1 %v2848_v0 }
0x27cc   :  { %2651 = vmatpush3.msra.mxu1 %v2178_v5 }
0x27cd   :  { %2652 = vmatprep.subr.mxu1 %v2848_v0 }
0x27ce   :  { %2653 = vmatpush3.msra.mxu1 %v2177_v8 }
0x27cf   :  { %2654 = vmatprep.subr.mxu1 %v2848_v0 }
0x27d0   :  { %2655 = vmatpush3.msra.mxu1 %v2176_v9 }
0x27d1   :  { %2656 = vmatprep.subr.mxu1 %v2848_v0 }
0x27d2   :  { %2657 = vmatpush3.msra.mxu1 %v2175_v10 }
0x27d3   :  { %2658 = vmatprep.subr.mxu1 %v2848_v0 }
0x27d4   :  { %2659 = vmatpush3.msra.mxu1 %v2174_v12 }
0x27d5   :  { %2660 = vmatprep.subr.mxu1 %v2848_v0 }
0x27d6   :  { %2661 = vmatpush3.msra.mxu1 %v2173_v13 }
0x27d7   :  { %2662 = vmatprep.subr.mxu1 %v2848_v0 }
0x27d8   :  { %2663 = vmatpush3.msra.mxu1 %v2172_v46 }
0x27d9   :  { %2664 = vmatprep.subr.mxu1 %v2848_v0 }
0x27da   :  { %2665 = vmatpush3.msra.mxu1 %v2171_v16 }
0x27db   :  { %2666 = vmatprep.subr.mxu1 %v2848_v0 }
0x27dc   :  { %2667 = vmatpush3.msra.mxu1 %v2170_v17 }
0x27dd   :  { %2668 = vmatprep.subr.mxu1 %v2848_v0 }
0x27de   :  { %2669 = vmatpush3.msra.mxu1 %v2169_v18 }
0x287f   :  { %v2043_v22 = vpop.f32.mrf.mxu1 }
0x2880   :  { %v2057_v11 = vadd.f32 %v2043_v22, %v3219_v57  ;;  %v2048_v43 = vrot.slane %v2043_v22, 2 }
0x2881   :  { %v2626_v50 = vpop.f32.mrf.mxu1 }
0x2882   :  { %v2059_v41 = vrot.slane %v2057_v11, 2  ;;  %v2050_v27 = vadd.f32 %v2048_v43, %v3238_v63 }
0x2884   :  { %2060 = vrot.lane.b32.xlu1 %v2059_v41, %s2850_s24  ;;  %v2317_v44 = vmul.f32 -1.442695, %v2050_v27 }
0x2886   :  { %2772 = vpow2.f32 %v2317_v44 }
0x2893   :  { %v2773_v45 = vpop.eup %2772 }
0x2894   :  { %v2054_v32 = vadd.f32 1.0, %v2773_v45 }
0x2896   :  { %2774 = vrcp.f32 %v2054_v32 }
0x28a3   :  { %v2775_v47 = vpop.eup %2774 }
0x28a4   :  { %v2070_v59 = vsub.f32 1.0, %v2775_v47  ;;  %v2078_v61 = vmul.f32 %v2775_v47, %v2076_v40 }
0x28f6   :  { %v2061_v48 = vpop.permute.xlu1 %2060 }
0x28f7   :  { %v2063_v49 = vmul.f32 %v2775_v47, %v2061_v48 }
0x28f9   :  { %2065 = vrot.lane.b32.xlu0 %v2063_v49, %s2850_s24 }
0x296b   :  { %v2066_v51 = vpop.permute.xlu0 %2065 }
0x296c   :  { %v2068_v57 = vadd.f32 %v2066_v51, %v3238_v63  ;;  %v2081_v63 = vld [vmem:[%s3454_s9] sm:$0xff] }
0x296d   :  { %2634 = vmatpush3.msra.mxu0 %v2081_v63 }
0x296e   :  { %2776 = vtanh.f32 %v2068_v57 }
0x297b   :  { %v2777_v38 = vpop.eup %2776 }
0x297c   :  { %2072 = vrot.lane.b32.xlu1 %v2777_v38, %s2851_s3 }
0x29ee   :  { %v2073_v60 = vpop.permute.xlu1 %2072 }
0x29ef   :  { %v2075_v62 = vmul.f32 %v2073_v60, %v2070_v59 }
0x29f1   :  { %v2079_v1 = vadd.f32 %v2078_v61, %v2075_v62 }
0x29f3   :  { %v2080_v4 = vmax.f32 %v2079_v1, 0.0 }
0x29f5   :  { %v2093_v6 = vrot.slane %v2080_v4, 6 }
0x29f7   :  { %2094 = vrot.lane.b32.xlu0 %v2093_v6, %s2851_s3 }
0x2a69   :  { %v2095_v15 = vpop.permute.xlu0 %2094 }
0x2a6a   :  { %2636 = vmatmul.mubr.msk.f32.vlgmr.msra.gmra.mxu0 %vm227_vm10, %v2095_v15 }
0x2b2a   :  { %v2164_v20 = vpop.f32.mrf.mxu0 }
0x2b2b   :  { %v2165_v21 = vadd.f32 %v2318_v19, %v2164_v20 }
0x2b2c   :  { %v2637_v23 = vpop.f32.mrf.mxu0 }
0x2b2d   :  { %v2168_v24 = vmax.f32 %v2165_v21, 0.0 }
0x2b2f   :  { %2671 = vmatmul.mubr.f32.vlgmr.msra.gmra.mxu1 %v2168_v24 }
0x2bef   :  { %v2258_v0 = vpop.f32.mrf.mxu1 }
0x2bf0   :  { %v2259_v26 = vadd.f32 %v2320_v25, %v2258_v0 }
0x2bf1   :  { %v2672_v28 = vpop.f32.mrf.mxu1 }
0x2bf2   :  { %2263 = vst.msk [vmem:[#allocation8] sm:$0x3] %vm2262_vm14, %v2259_v26 }
0x2bf3   :  { %2829 = shalt.err (!%p2826_p0)
}
0x2bf4   :  { %2273 = dma.vmem_to_hbm [thread:$0]  %s2271_s21, 32, %s3458_s13, [#allocation5]  }
0x2bf5   :  { %2842 = dma.done.wait [#allocation5], 32  }
0x2bf6   :  { %2843 = vsyncadd [#allocation5], 4294967264 }
0x2bf7   :  { %2277 = vsyncpa [#allocation4], 1 }
0x2bf8   :  { %2278 = vsyncpa [#allocation7], 1 }
0x2bf9   :  { %2279 = vsyncpa [#allocation5], 1 }

</bundles_post_ra>
